<compile_context>
chip_gen: v6e
topology: v6e:2x2x1
jax: 0.10.0
libtpu: 0.0.40
codegen_flags: <defaults>
</compile_context>

<pallas_src>
import numpy as np
import jax
import jax.numpy as jnp
from jax.experimental import pallas as pl
from jax.experimental.pallas import tpu as pltpu


# ----------------------------------------------------------------------------
# Parameter construction (PyTorch layouts, deterministic)
# ----------------------------------------------------------------------------
def init_params(key, word_dim=256, filter_num=256, kernel_size=3):
    ks = jax.random.split(key, 10)
    k = kernel_size

    def conv_init(kw, kb, cin, cout):
        bound = 1.0 / np.sqrt(cin * k)          # nn.Conv1d default init bound
        w = jax.random.uniform(kw, (cout, cin, k), jnp.float32, -bound, bound)
        b = jax.random.uniform(kb, (cout,), jnp.float32, -bound, bound)
        return w, b

    conv1_w, conv1_b = conv_init(ks[0], ks[1], word_dim, filter_num)
    conv2_w, conv2_b = conv_init(ks[2], ks[3], filter_num, filter_num)

    # nn.LayerNorm default init is ones/zeros; perturb so the affine path and
    # the LN2/Linear fold are actually exercised by the correctness check.
    ln1_g = 1.0 + 0.1 * jax.random.normal(ks[4], (filter_num,), jnp.float32)
    ln1_b = 0.1 * jax.random.normal(ks[5], (filter_num,), jnp.float32)
    ln2_g = 1.0 + 0.1 * jax.random.normal(ks[6], (filter_num,), jnp.float32)
    ln2_b = 0.1 * jax.random.normal(ks[7], (filter_num,), jnp.float32)

    lbound = 1.0 / np.sqrt(filter_num)          # nn.Linear default init bound
    lin_w = jax.random.uniform(ks[8], (1, filter_num), jnp.float32, -lbound, lbound)
    lin_b = jax.random.uniform(ks[9], (1,), jnp.float32, -lbound, lbound)

    return dict(conv1_w=conv1_w, conv1_b=conv1_b,
                conv2_w=conv2_w, conv2_b=conv2_b,
                ln1_g=ln1_g, ln1_b=ln1_b, ln2_g=ln2_g, ln2_b=ln2_b,
                lin_w=lin_w, lin_b=lin_b)


def prepare_params(raw):
    """One-time precompute: per-tap transposed conv weights + LN2/Linear fold."""
    F = raw["conv1_w"].shape[0]
    # Conv1d weight (Cout, Cin, K) -> per-tap (K, Cin, Cout) so kernel does x @ W_k.
    w1_taps = jnp.transpose(raw["conv1_w"], (2, 1, 0))
    w2_taps = jnp.transpose(raw["conv2_w"], (2, 1, 0))
    # Fold LayerNorm2 affine into the final Linear(F, 1):
    #   out = sum_f (g2_f*xhat_f + b2_f)*w_f + b  =  sum_f xhat_f*(g2_f*w_f) + c2
    g2w = (raw["ln2_g"] * raw["lin_w"][0]).reshape(1, F)
    c2 = (jnp.sum(raw["ln2_b"] * raw["lin_w"][0]) + raw["lin_b"][0]).reshape(1)
    return dict(
        w1=w1_taps, b1=raw["conv1_b"].reshape(1, F),
        g1=raw["ln1_g"].reshape(1, F), be1=raw["ln1_b"].reshape(1, F),
        w2=w2_taps, b2=raw["conv2_b"].reshape(1, F),
        g2w=g2w, c2=c2,
    )


# ----------------------------------------------------------------------------
# Pallas kernel
# ----------------------------------------------------------------------------
def _length_predictor_kernel(x_ref, w1_ref, b1_ref, g1_ref, be1_ref,
                             w2_ref, b2_ref, g2w_ref, c2_ref,
                             out_ref, xpad_ref, hpad_ref):
    # x_ref:   (1, S, D)       w1_ref: (3, D, F)   b1/g1/be1: (1, F)
    # w2_ref:  (3, F, F)       b2/g2w: (1, F)      c2_ref: (1,) in SMEM
    # out_ref: (1, S, 1)       xpad_ref: (S+2, D)  hpad_ref: (S+2, F)  [VMEM]
    x = x_ref[0]                                   # (S, D) f32
    S = x.shape[0]
    F = w1_ref.shape[2]
    inv_f = 1.0 / F
    eps = 1e-5

    def conv3(inp, w_ref, b_ref, pad_ref):
        """Conv1d over rows (seq axis), kernel_size=3, padding=1."""
        zero_row = jnp.zeros((1, inp.shape[1]), jnp.float32)
        pad_ref[pl.ds(0, 1), :] = zero_row                 # left zero pad
        pad_ref[pl.ds(S + 1, 1), :] = zero_row             # right zero pad
        pad_ref[pl.ds(1, S), :] = inp                      # body
        # y[s] = x[s-1] @ W0 + x[s] @ W1 + x[s+1] @ W2 + b   (MXU, f32 acc)
        y = jnp.dot(pad_ref[pl.ds(0, S), :], w_ref[0],
                    preferred_element_type=jnp.float32)
        y = y + jnp.dot(inp, w_ref[1],
                        preferred_element_type=jnp.float32)
        y = y + jnp.dot(pad_ref[pl.ds(2, S), :], w_ref[2],
                        preferred_element_type=jnp.float32)
        return y + b_ref[...]

    def normalize(h):
        """LayerNorm over last dim, no affine (biased variance, eps=1e-5)."""
        mean = jnp.sum(h, axis=-1, keepdims=True) * inv_f
        c = h - mean
        var = jnp.sum(c * c, axis=-1, keepdims=True) * inv_f
        return c * jax.lax.rsqrt(var + eps)

    # Block 1: Conv -> ReLU -> LayerNorm (Dropout = identity at inference).
    h = conv3(x, w1_ref, b1_ref, xpad_ref)
    h = jnp.maximum(h, 0.0)
    h = normalize(h) * g1_ref[...] + be1_ref[...]

    # Block 2: Conv -> ReLU -> LayerNorm folded with Linear(F, 1).
    h = conv3(h, w2_ref, b2_ref, hpad_ref)
    h = jnp.maximum(h, 0.0)
    xhat = normalize(h)
    out = jnp.sum(xhat * g2w_ref[...], axis=-1, keepdims=True) + c2_ref[0]
    out_ref[0] = out.astype(out_ref.dtype)                 # (S, 1)


def length_predictor_forward(x, kparams, mask=None):
    """x: (B, S, word_dim) float32.  Returns (B, S) float32."""
    B, S, D = x.shape
    K, D_in, F = kparams["w1"].shape
    assert K == 3 and D_in == D, "kernel supports kernel_size=3, padding=1 convs"

    out3 = pl.pallas_call(
        _length_predictor_kernel,
        out_shape=jax.ShapeDtypeStruct((B, S, 1), jnp.float32),
        grid_spec=pltpu.PrefetchScalarGridSpec(
            num_scalar_prefetch=0,
            grid=(B,),
            in_specs=[
                pl.BlockSpec((1, S, D), lambda b: (b, 0, 0)),        # x
                pl.BlockSpec((3, D, F), lambda b: (0, 0, 0)),        # conv1 taps
                pl.BlockSpec((1, F), lambda b: (0, 0)),              # conv1 bias
                pl.BlockSpec((1, F), lambda b: (0, 0)),              # ln1 gamma
                pl.BlockSpec((1, F), lambda b: (0, 0)),              # ln1 beta
                pl.BlockSpec((3, F, F), lambda b: (0, 0, 0)),        # conv2 taps
                pl.BlockSpec((1, F), lambda b: (0, 0)),              # conv2 bias
                pl.BlockSpec((1, F), lambda b: (0, 0)),              # ln2*linear fold
                pl.BlockSpec(memory_space=pltpu.MemorySpace.SMEM),   # folded scalar
            ],
            out_specs=pl.BlockSpec((1, S, 1), lambda b: (b, 0, 0)),
            scratch_shapes=[
                pltpu.VMEM((S + 2, D), jnp.float32),   # zero-padded conv1 input
                pltpu.VMEM((S + 2, F), jnp.float32),   # zero-padded conv2 input
            ],
        ),
        compiler_params=pltpu.CompilerParams(
            dimension_semantics=("parallel",),
        ),
    )(x, kparams["w1"], kparams["b1"], kparams["g1"], kparams["be1"],
      kparams["w2"], kparams["b2"], kparams["g2w"], kparams["c2"])

    out = out3[:, :, 0]                                    # squeeze(-1)
    if mask is not None:
        out = jnp.where(mask, 0.0, out)                    # masked_fill(mask, 0.0)
    return out


# ----------------------------------------------------------------------------
# Pure-JAX reference (PyTorch-layout params, independent math path)
# ----------------------------------------------------------------------------
def reference_forward(x, raw, config, mask=None):
    k = config["kernel_size"]

    def conv1d(h, w, b, pad):
        B, S, _ = h.shape
        hp = jnp.pad(h, ((0, 0), (pad, pad), (0, 0)))
        out = jnp.zeros((B, S, w.shape[0]), jnp.float32) + b[None, None, :]
        for kk in range(w.shape[2]):
            out = out + jnp.einsum("bsc,oc->bso", hp[:, kk:kk + S, :],
                                   w[:, :, kk], precision="highest")
        return out

    def layer_norm(h, g, be):
        m = jnp.mean(h, axis=-1, keepdims=True)
        v = jnp.mean(jnp.square(h - m), axis=-1, keepdims=True)
        return (h - m) / jnp.sqrt(v + 1e-5) * g + be

    h = conv1d(x, raw["conv1_w"], raw["conv1_b"], (k - 1) // 2)
    h = jax.nn.relu(h)
    h = layer_norm(h, raw["ln1_g"], raw["ln1_b"])
    h = conv1d(h, raw["conv2_w"], raw["conv2_b"], 1)
    h = jax.nn.relu(h)
    h = layer_norm(h, raw["ln2_g"], raw["ln2_b"])
    out = jnp.einsum("bsf,of->bso", h, raw["lin_w"], precision="highest")
    out = out[..., 0] + raw["lin_b"][0]
    if mask is not None:
        out = jnp.where(mask, 0.0, out)
    return out


if __name__ == "__main__":
    config = dict(filter_num=256, kernel_size=3, dropout=0.5)
    WORD_DIM = 256
    B, S = 2, 16

    key = jax.random.PRNGKey(0)
    k_params, k_x = jax.random.split(key)
    raw = init_params(k_params, WORD_DIM, config["filter_num"], config["kernel_size"])
    kparams = prepare_params(raw)          # one-time precompute, off the hot path

    x = jax.random.normal(k_x, (B, S, WORD_DIM), dtype=jnp.float32)

    out = jax.block_until_ready(length_predictor_forward(x, kparams))
    ref = jax.block_until_ready(reference_forward(x, raw, config))

    assert out.shape == (B, S)
    max_err = float(jnp.max(jnp.abs(out - ref)))
    assert jnp.allclose(out, ref, atol=1e-3, rtol=1e-3), \
        f"mismatch vs reference (max abs err {max_err})"

    print("KERNEL_OK")
</pallas_src>

<mosaic_0001>
module attributes {stable_mosaic.version = 11 : i64} {
  func.func @_length_predictor_kernel(%arg0: i32, %arg1: memref<1x16x256xf32, #tpu.memory_space<vmem>>, %arg2: memref<3x256x256xf32, #tpu.memory_space<vmem>>, %arg3: memref<1x256xf32, #tpu.memory_space<vmem>>, %arg4: memref<1x256xf32, #tpu.memory_space<vmem>>, %arg5: memref<1x256xf32, #tpu.memory_space<vmem>>, %arg6: memref<3x256x256xf32, #tpu.memory_space<vmem>>, %arg7: memref<1x256xf32, #tpu.memory_space<vmem>>, %arg8: memref<1x256xf32, #tpu.memory_space<vmem>>, %arg9: memref<1xf32, #tpu.memory_space<smem>>, %arg10: memref<1x16x1xf32, #tpu.memory_space<vmem>>, %arg11: memref<18x256xf32, #tpu.memory_space<vmem>>, %arg12: memref<18x256xf32, #tpu.memory_space<vmem>>) attributes {dimension_semantics = [#tpu.dimension_semantics<parallel>], iteration_bounds = array<i64: 2>, scalar_prefetch = 0 : i64, scratch_operands = 2 : i64, tpu.core_type = #tpu.core_type<tc>, window_params = [{transform_indices = @transform_0, window_bounds = array<i64: 1, 16, 256>}, {pipeline_mode = #tpu.pipeline_mode<synchronous>, transform_indices = @transform_1, window_bounds = array<i64: 3, 256, 256>}, {pipeline_mode = #tpu.pipeline_mode<synchronous>, transform_indices = @transform_2, window_bounds = array<i64: 1, 256>}, {pipeline_mode = #tpu.pipeline_mode<synchronous>, transform_indices = @transform_3, window_bounds = array<i64: 1, 256>}, {pipeline_mode = #tpu.pipeline_mode<synchronous>, transform_indices = @transform_4, window_bounds = array<i64: 1, 256>}, {pipeline_mode = #tpu.pipeline_mode<synchronous>, transform_indices = @transform_5, window_bounds = array<i64: 3, 256, 256>}, {pipeline_mode = #tpu.pipeline_mode<synchronous>, transform_indices = @transform_6, window_bounds = array<i64: 1, 256>}, {pipeline_mode = #tpu.pipeline_mode<synchronous>, transform_indices = @transform_7, window_bounds = array<i64: 1, 256>}, {transform_indices = @transform_8, window_bounds = array<i64: 1>}, {transform_indices = @transform_9, window_bounds = array<i64: 1, 16, 1>}]} {
    %c0 = arith.constant 0 : index
    %c0_0 = arith.constant 0 : index
    %c0_1 = arith.constant 0 : index
    %0 = vector.load %arg1[%c0, %c0_0, %c0_1] : memref<1x16x256xf32, #tpu.memory_space<vmem>>, vector<1x16x256xf32>
    %1 = vector.shape_cast %0 : vector<1x16x256xf32> to vector<16x256xf32>
    %cst = arith.constant 0.000000e+00 : f32
    %2 = vector.broadcast %cst : f32 to vector<1x256xf32>
    %c0_2 = arith.constant 0 : index
    %c0_3 = arith.constant 0 : index
    %3 = vector.load %arg11[%c0_2, %c0_3] : memref<18x256xf32, #tpu.memory_space<vmem>>, vector<1x256xf32>
    tpu.vector_store %arg11[%c0_2, %c0_3], %2 {strides = array<i32>} : memref<18x256xf32, #tpu.memory_space<vmem>>, vector<1x256xf32>,
    %c17 = arith.constant 17 : index
    %c0_4 = arith.constant 0 : index
    %4 = vector.load %arg11[%c17, %c0_4] : memref<18x256xf32, #tpu.memory_space<vmem>>, vector<1x256xf32>
    tpu.vector_store %arg11[%c17, %c0_4], %2 {strides = array<i32>} : memref<18x256xf32, #tpu.memory_space<vmem>>, vector<1x256xf32>,
    %c1 = arith.constant 1 : index
    %c0_5 = arith.constant 0 : index
    %5 = vector.load %arg11[%c1, %c0_5] : memref<18x256xf32, #tpu.memory_space<vmem>>, vector<16x256xf32>
    tpu.vector_store %arg11[%c1, %c0_5], %1 {strides = array<i32>} : memref<18x256xf32, #tpu.memory_space<vmem>>, vector<16x256xf32>,
    %c0_6 = arith.constant 0 : index
    %c0_7 = arith.constant 0 : index
    %6 = vector.load %arg11[%c0_6, %c0_7] : memref<18x256xf32, #tpu.memory_space<vmem>>, vector<16x256xf32>
    %c0_8 = arith.constant 0 : index
    %c0_9 = arith.constant 0 : index
    %c0_10 = arith.constant 0 : index
    %7 = vector.load %arg2[%c0_8, %c0_9, %c0_10] : memref<3x256x256xf32, #tpu.memory_space<vmem>>, vector<1x256x256xf32>
    %8 = vector.shape_cast %7 : vector<1x256x256xf32> to vector<256x256xf32>
    %cst_11 = arith.constant dense<0.000000e+00> : vector<16x256xf32>
    %9 = tpu.matmul %6, %8, %cst_11 {dimension_numbers = #tpu.dot_dimension_numbers<[1], [0], [0], [1], [0, 0, 1, 1], [], []>} : vector<16x256xf32>, vector<256x256xf32>, vector<16x256xf32> -> vector<16x256xf32>
    %c1_12 = arith.constant 1 : index
    %c0_13 = arith.constant 0 : index
    %c0_14 = arith.constant 0 : index
    %10 = vector.load %arg2[%c1_12, %c0_13, %c0_14] : memref<3x256x256xf32, #tpu.memory_space<vmem>>, vector<1x256x256xf32>
    %11 = vector.shape_cast %10 : vector<1x256x256xf32> to vector<256x256xf32>
    %cst_15 = arith.constant dense<0.000000e+00> : vector<16x256xf32>
    %12 = tpu.matmul %1, %11, %cst_15 {dimension_numbers = #tpu.dot_dimension_numbers<[1], [0], [0], [1], [0, 0, 1, 1], [], []>} : vector<16x256xf32>, vector<256x256xf32>, vector<16x256xf32> -> vector<16x256xf32>
    %13 = arith.addf %9, %12 : vector<16x256xf32>
    %c2 = arith.constant 2 : index
    %c0_16 = arith.constant 0 : index
    %14 = vector.load %arg11[%c2, %c0_16] : memref<18x256xf32, #tpu.memory_space<vmem>>, vector<16x256xf32>
    %c2_17 = arith.constant 2 : index
    %c0_18 = arith.constant 0 : index
    %c0_19 = arith.constant 0 : index
    %15 = vector.load %arg2[%c2_17, %c0_18, %c0_19] : memref<3x256x256xf32, #tpu.memory_space<vmem>>, vector<1x256x256xf32>
    %16 = vector.shape_cast %15 : vector<1x256x256xf32> to vector<256x256xf32>
    %cst_20 = arith.constant dense<0.000000e+00> : vector<16x256xf32>
    %17 = tpu.matmul %14, %16, %cst_20 {dimension_numbers = #tpu.dot_dimension_numbers<[1], [0], [0], [1], [0, 0, 1, 1], [], []>} : vector<16x256xf32>, vector<256x256xf32>, vector<16x256xf32> -> vector<16x256xf32>
    %18 = arith.addf %13, %17 : vector<16x256xf32>
    %c0_21 = arith.constant 0 : index
    %c0_22 = arith.constant 0 : index
    %19 = vector.load %arg3[%c0_21, %c0_22] : memref<1x256xf32, #tpu.memory_space<vmem>>, vector<1x256xf32>
    %20 = vector.broadcast %19 : vector<1x256xf32> to vector<16x256xf32>
    %21 = arith.addf %18, %20 : vector<16x256xf32>
    %cst_23 = arith.constant 0.000000e+00 : f32
    %22 = vector.broadcast %cst_23 : f32 to vector<16x256xf32>
    %23 = arith.maximumf %21, %22 : vector<16x256xf32>
    %cst_24 = arith.constant dense<0.000000e+00> : vector<16xf32>
    %24 = vector.multi_reduction <add>, %23, %cst_24 [1] : vector<16x256xf32> to vector<16xf32>
    %25 = vector.shape_cast %24 : vector<16xf32> to vector<16x1xf32>
    %cst_25 = arith.constant 3.906250e-03 : f32
    %26 = vector.broadcast %cst_25 : f32 to vector<16x1xf32>
    %27 = arith.mulf %25, %26 : vector<16x1xf32>
    %28 = vector.broadcast %27 : vector<16x1xf32> to vector<16x256xf32>
    %29 = arith.subf %23, %28 : vector<16x256xf32>
    %30 = arith.mulf %29, %29 : vector<16x256xf32>
    %cst_26 = arith.constant dense<0.000000e+00> : vector<16xf32>
    %31 = vector.multi_reduction <add>, %30, %cst_26 [1] : vector<16x256xf32> to vector<16xf32>
    %32 = vector.shape_cast %31 : vector<16xf32> to vector<16x1xf32>
    %cst_27 = arith.constant 3.906250e-03 : f32
    %33 = vector.broadcast %cst_27 : f32 to vector<16x1xf32>
    %34 = arith.mulf %32, %33 : vector<16x1xf32>
    %cst_28 = arith.constant 9.99999974E-6 : f32
    %35 = vector.broadcast %cst_28 : f32 to vector<16x1xf32>
    %36 = arith.addf %34, %35 : vector<16x1xf32>
    %37 = math.rsqrt %36 : vector<16x1xf32>
    %38 = vector.broadcast %37 : vector<16x1xf32> to vector<16x256xf32>
    %39 = arith.mulf %29, %38 : vector<16x256xf32>
    %c0_29 = arith.constant 0 : index
    %c0_30 = arith.constant 0 : index
    %40 = vector.load %arg4[%c0_29, %c0_30] : memref<1x256xf32, #tpu.memory_space<vmem>>, vector<1x256xf32>
    %41 = vector.broadcast %40 : vector<1x256xf32> to vector<16x256xf32>
    %42 = arith.mulf %39, %41 : vector<16x256xf32>
    %c0_31 = arith.constant 0 : index
    %c0_32 = arith.constant 0 : index
    %43 = vector.load %arg5[%c0_31, %c0_32] : memref<1x256xf32, #tpu.memory_space<vmem>>, vector<1x256xf32>
    %44 = vector.broadcast %43 : vector<1x256xf32> to vector<16x256xf32>
    %45 = arith.addf %42, %44 : vector<16x256xf32>
    %cst_33 = arith.constant 0.000000e+00 : f32
    %46 = vector.broadcast %cst_33 : f32 to vector<1x256xf32>
    %c0_34 = arith.constant 0 : index
    %c0_35 = arith.constant 0 : index
    %47 = vector.load %arg12[%c0_34, %c0_35] : memref<18x256xf32, #tpu.memory_space<vmem>>, vector<1x256xf32>
    tpu.vector_store %arg12[%c0_34, %c0_35], %46 {strides = array<i32>} : memref<18x256xf32, #tpu.memory_space<vmem>>, vector<1x256xf32>,
    %c17_36 = arith.constant 17 : index
    %c0_37 = arith.constant 0 : index
    %48 = vector.load %arg12[%c17_36, %c0_37] : memref<18x256xf32, #tpu.memory_space<vmem>>, vector<1x256xf32>
    tpu.vector_store %arg12[%c17_36, %c0_37], %46 {strides = array<i32>} : memref<18x256xf32, #tpu.memory_space<vmem>>, vector<1x256xf32>,
    %c1_38 = arith.constant 1 : index
    %c0_39 = arith.constant 0 : index
    %49 = vector.load %arg12[%c1_38, %c0_39] : memref<18x256xf32, #tpu.memory_space<vmem>>, vector<16x256xf32>
    tpu.vector_store %arg12[%c1_38, %c0_39], %45 {strides = array<i32>} : memref<18x256xf32, #tpu.memory_space<vmem>>, vector<16x256xf32>,
    %c0_40 = arith.constant 0 : index
    %c0_41 = arith.constant 0 : index
    %50 = vector.load %arg12[%c0_40, %c0_41] : memref<18x256xf32, #tpu.memory_space<vmem>>, vector<16x256xf32>
    %c0_42 = arith.constant 0 : index
    %c0_43 = arith.constant 0 : index
    %c0_44 = arith.constant 0 : index
    %51 = vector.load %arg6[%c0_42, %c0_43, %c0_44] : memref<3x256x256xf32, #tpu.memory_space<vmem>>, vector<1x256x256xf32>
    %52 = vector.shape_cast %51 : vector<1x256x256xf32> to vector<256x256xf32>
    %cst_45 = arith.constant dense<0.000000e+00> : vector<16x256xf32>
    %53 = tpu.matmul %50, %52, %cst_45 {dimension_numbers = #tpu.dot_dimension_numbers<[1], [0], [0], [1], [0, 0, 1, 1], [], []>} : vector<16x256xf32>, vector<256x256xf32>, vector<16x256xf32> -> vector<16x256xf32>
    %c1_46 = arith.constant 1 : index
    %c0_47 = arith.constant 0 : index
    %c0_48 = arith.constant 0 : index
    %54 = vector.load %arg6[%c1_46, %c0_47, %c0_48] : memref<3x256x256xf32, #tpu.memory_space<vmem>>, vector<1x256x256xf32>
    %55 = vector.shape_cast %54 : vector<1x256x256xf32> to vector<256x256xf32>
    %cst_49 = arith.constant dense<0.000000e+00> : vector<16x256xf32>
    %56 = tpu.matmul %45, %55, %cst_49 {dimension_numbers = #tpu.dot_dimension_numbers<[1], [0], [0], [1], [0, 0, 1, 1], [], []>} : vector<16x256xf32>, vector<256x256xf32>, vector<16x256xf32> -> vector<16x256xf32>
    %57 = arith.addf %53, %56 : vector<16x256xf32>
    %c2_50 = arith.constant 2 : index
    %c0_51 = arith.constant 0 : index
    %58 = vector.load %arg12[%c2_50, %c0_51] : memref<18x256xf32, #tpu.memory_space<vmem>>, vector<16x256xf32>
    %c2_52 = arith.constant 2 : index
    %c0_53 = arith.constant 0 : index
    %c0_54 = arith.constant 0 : index
    %59 = vector.load %arg6[%c2_52, %c0_53, %c0_54] : memref<3x256x256xf32, #tpu.memory_space<vmem>>, vector<1x256x256xf32>
    %60 = vector.shape_cast %59 : vector<1x256x256xf32> to vector<256x256xf32>
    %cst_55 = arith.constant dense<0.000000e+00> : vector<16x256xf32>
    %61 = tpu.matmul %58, %60, %cst_55 {dimension_numbers = #tpu.dot_dimension_numbers<[1], [0], [0], [1], [0, 0, 1, 1], [], []>} : vector<16x256xf32>, vector<256x256xf32>, vector<16x256xf32> -> vector<16x256xf32>
    %62 = arith.addf %57, %61 : vector<16x256xf32>
    %c0_56 = arith.constant 0 : index
    %c0_57 = arith.constant 0 : index
    %63 = vector.load %arg7[%c0_56, %c0_57] : memref<1x256xf32, #tpu.memory_space<vmem>>, vector<1x256xf32>
    %64 = vector.broadcast %63 : vector<1x256xf32> to vector<16x256xf32>
    %65 = arith.addf %62, %64 : vector<16x256xf32>
    %cst_58 = arith.constant 0.000000e+00 : f32
    %66 = vector.broadcast %cst_58 : f32 to vector<16x256xf32>
    %67 = arith.maximumf %65, %66 : vector<16x256xf32>
    %cst_59 = arith.constant dense<0.000000e+00> : vector<16xf32>
    %68 = vector.multi_reduction <add>, %67, %cst_59 [1] : vector<16x256xf32> to vector<16xf32>
    %69 = vector.shape_cast %68 : vector<16xf32> to vector<16x1xf32>
    %cst_60 = arith.constant 3.906250e-03 : f32
    %70 = vector.broadcast %cst_60 : f32 to vector<16x1xf32>
    %71 = arith.mulf %69, %70 : vector<16x1xf32>
    %72 = vector.broadcast %71 : vector<16x1xf32> to vector<16x256xf32>
    %73 = arith.subf %67, %72 : vector<16x256xf32>
    %74 = arith.mulf %73, %73 : vector<16x256xf32>
    %cst_61 = arith.constant dense<0.000000e+00> : vector<16xf32>
    %75 = vector.multi_reduction <add>, %74, %cst_61 [1] : vector<16x256xf32> to vector<16xf32>
    %76 = vector.shape_cast %75 : vector<16xf32> to vector<16x1xf32>
    %cst_62 = arith.constant 3.906250e-03 : f32
    %77 = vector.broadcast %cst_62 : f32 to vector<16x1xf32>
    %78 = arith.mulf %76, %77 : vector<16x1xf32>
    %cst_63 = arith.constant 9.99999974E-6 : f32
    %79 = vector.broadcast %cst_63 : f32 to vector<16x1xf32>
    %80 = arith.addf %78, %79 : vector<16x1xf32>
    %81 = math.rsqrt %80 : vector<16x1xf32>
    %82 = vector.broadcast %81 : vector<16x1xf32> to vector<16x256xf32>
    %83 = arith.mulf %73, %82 : vector<16x256xf32>
    %c0_64 = arith.constant 0 : index
    %c0_65 = arith.constant 0 : index
    %84 = vector.load %arg8[%c0_64, %c0_65] : memref<1x256xf32, #tpu.memory_space<vmem>>, vector<1x256xf32>
    %85 = vector.broadcast %84 : vector<1x256xf32> to vector<16x256xf32>
    %86 = arith.mulf %83, %85 : vector<16x256xf32>
    %cst_66 = arith.constant dense<0.000000e+00> : vector<16xf32>
    %87 = vector.multi_reduction <add>, %86, %cst_66 [1] : vector<16x256xf32> to vector<16xf32>
    %88 = vector.shape_cast %87 : vector<16xf32> to vector<16x1xf32>
    %c0_67 = arith.constant 0 : index
    %89 = memref.load %arg9[%c0_67] : memref<1xf32, #tpu.memory_space<smem>>
    %90 = vector.broadcast %89 : f32 to vector<16x1xf32>
    %91 = arith.addf %88, %90 : vector<16x1xf32>
    %c0_68 = arith.constant 0 : index
    %c0_69 = arith.constant 0 : index
    %c0_70 = arith.constant 0 : index
    %92 = vector.load %arg10[%c0_68, %c0_69, %c0_70] : memref<1x16x1xf32, #tpu.memory_space<vmem>>, vector<1x16x1xf32>
    %93 = vector.shape_cast %92 : vector<1x16x1xf32> to vector<16x1xf32>
    %94 = vector.shape_cast %91 : vector<16x1xf32> to vector<1x16x1xf32>
    tpu.vector_store %arg10[%c0_68, %c0_69, %c0_70], %94 {strides = array<i32>} : memref<1x16x1xf32, #tpu.memory_space<vmem>>, vector<1x16x1xf32>,
    return
  }
  func.func @transform_0(%arg0: i32) -> (i32, i32, i32) {
    %c0_i32 = arith.constant 0 : i32
    %c0_i32_0 = arith.constant 0 : i32
    %c0_i32_1 = arith.constant 0 : i32
    return %arg0, %c0_i32, %c0_i32_0 : i32, i32, i32
  }
  func.func @transform_1(%arg0: i32) -> (i32, i32, i32) {
    %c0_i32 = arith.constant 0 : i32
    %c0_i32_0 = arith.constant 0 : i32
    %c0_i32_1 = arith.constant 0 : i32
    %c0_i32_2 = arith.constant 0 : i32
    return %c0_i32, %c0_i32_0, %c0_i32_1 : i32, i32, i32
  }
  func.func @transform_2(%arg0: i32) -> (i32, i32) {
    %c0_i32 = arith.constant 0 : i32
    %c0_i32_0 = arith.constant 0 : i32
    %c0_i32_1 = arith.constant 0 : i32
    return %c0_i32, %c0_i32_0 : i32, i32
  }
  func.func @transform_3(%arg0: i32) -> (i32, i32) {
    %c0_i32 = arith.constant 0 : i32
    %c0_i32_0 = arith.constant 0 : i32
    %c0_i32_1 = arith.constant 0 : i32
    return %c0_i32, %c0_i32_0 : i32, i32
  }
  func.func @transform_4(%arg0: i32) -> (i32, i32) {
    %c0_i32 = arith.constant 0 : i32
    %c0_i32_0 = arith.constant 0 : i32
    %c0_i32_1 = arith.constant 0 : i32
    return %c0_i32, %c0_i32_0 : i32, i32
  }
  func.func @transform_5(%arg0: i32) -> (i32, i32, i32) {
    %c0_i32 = arith.constant 0 : i32
    %c0_i32_0 = arith.constant 0 : i32
    %c0_i32_1 = arith.constant 0 : i32
    %c0_i32_2 = arith.constant 0 : i32
    return %c0_i32, %c0_i32_0, %c0_i32_1 : i32, i32, i32
  }
  func.func @transform_6(%arg0: i32) -> (i32, i32) {
    %c0_i32 = arith.constant 0 : i32
    %c0_i32_0 = arith.constant 0 : i32
    %c0_i32_1 = arith.constant 0 : i32
    return %c0_i32, %c0_i32_0 : i32, i32
  }
  func.func @transform_7(%arg0: i32) -> (i32, i32) {
    %c0_i32 = arith.constant 0 : i32
    %c0_i32_0 = arith.constant 0 : i32
    %c0_i32_1 = arith.constant 0 : i32
    return %c0_i32, %c0_i32_0 : i32, i32
  }
  func.func @transform_8(%arg0: i32) -> i32 {
    %c0_i32 = arith.constant 0 : i32
    %c0_i32_0 = arith.constant 0 : i32
    return %c0_i32 : i32
  }
  func.func @transform_9(%arg0: i32) -> (i32, i32, i32) {
    %c0_i32 = arith.constant 0 : i32
    %c0_i32_0 = arith.constant 0 : i32
    %c0_i32_1 = arith.constant 0 : i32
    return %arg0, %c0_i32, %c0_i32_0 : i32, i32, i32
  }
}

</mosaic_0001>

<bundles_post_ra>
// kernel: tpu_custom_call.1
= control target key start
LH: loop header
LB: loop body
LE: loop exit
PB: predicated region body
PF: predicated region fallthrough
CT: control target
= control target key end

     0   :  { %s2167_s0 = inlined_call_operand.hbm [shape: f32[2,16,256], index: 0, kind: input, shape index: {}]   ;;  %s2168_s1 = inlined_call_operand.hbm [shape: f32[3,256,256], index: 1, kind: input, shape index: {}]   ;;  %s2169_s2 = inlined_call_operand.vmem [shape: f32[1,256], index: 2, kind: input, shape index: {}]   ;;  %s2170_s3 = inlined_call_operand.vmem [shape: f32[1,256], index: 3, kind: input, shape index: {}]   ;;  %s2171_s4 = inlined_call_operand.vmem [shape: f32[1,256], index: 4, kind: input, shape index: {}]   ;;  %s2172_s5 = inlined_call_operand.hbm [shape: f32[3,256,256], index: 5, kind: input, shape index: {}]   ;;  %s2173_s6 = inlined_call_operand.vmem [shape: f32[1,256], index: 6, kind: input, shape index: {}]   ;;  %s2174_s7 = inlined_call_operand.vmem [shape: f32[1,256], index: 7, kind: input, shape index: {}]   ;;  %s2175_s8 = inlined_call_operand.<no memory space> [shape: f32[1], index: 8, kind: input, shape index: {}]   ;;  %s2176_s9 = inlined_call_operand.vmem [shape: f32[2,16,1], index: 9, kind: output, shape index: {}]  }
   0x1   :  { %14 = sst [smem:[#allocation4]] %s2175_s8 }
   0x2   :  { %15 = vsyncpa [#allocation6], 0 }
   0x3   :  { %17 = vsyncpa [#allocation6 + $0x1], 0 }
   0x4   :  { %18 = vsyncpa [#allocation8], 0  ;;  %s1884_s11 = smov 0   ;;  %s1886_s12 = smov 0  }
   0x5   :  { %s1888_s13 = smov 0   ;;  %s1890_s14 = smov 0  }
   0x6 LB: > { %s1903_s8 = sadd.s32 4294967295, %s1823_s14   ;;  %p44_p0 = scmp.ne.s32.totalorder %s1815_s12, %s1811_s11  ;;  %s1823_s14 = sphi %s1890_s14, %s2191_s14   ;;  %s1819_s13 = sphi %s1888_s13, %s2190_s13   ;;  %s1815_s12 = sphi %s1886_s12, %s2189_s12   ;;  %s1811_s11 = sphi %s1884_s11, %s2188_s11  }
   0x7   : > { %p2177_p1 = scmp.eq.s32.totalorder %s1903_s8, 0  ;;  %p1617_p2 = scmp.ge.s32.totalorder %s1823_s14, 1 }
   0x8   : > { %p249_p3 = scmp.lt.s32.totalorder %s1823_s14, 3  ;;  %s1825_s17 = smov [#allocation7]  }
   0x9   : > { %p1911_p4 = por %p2177_p1, %p44_p0  ;;  %s261_s18 = sshll.u32 %s1825_s17, 4  ;;  %s262_s18 = int_to_ptr.vmem [resolvable:$true] %s261_s18 }
   0xa   : > { %p1915_p5 = pnand %p1617_p2, %p249_p3  ;;  %s1826_s20 = smov [#allocation9]  }
   0xb   : > { %s2180_s15 = scalar_select %p1911_p4, 1, 0 }
   0xc   : > { %s2181_s16 = scalar_select %p1915_p5, 1, 0 }
   0xd   : > { %p1644_p6 = pneg %p1915_p5  ;;  %s283_s21 = sshll.u32 %s1826_s20, 4  ;;  %s284_s21 = int_to_ptr.vmem [resolvable:$true] %s283_s21 }
   0xe   : > { %s1716_s22 = scalar_lea.vmem %s262_s18, 24576  ;;  %p1724_p12 = scmp.lt.s32.totalorder %s262_s18, %s262_s18 }
   0xf   : > { %p1923_p7 = pnand %p1644_p6, %p2177_p1  ;;  %p1717_p9 = scmp.ne.s32.totalorder %s262_s18, %s1716_s22 }
  0x10   : > { %p1725_p13 = scmp.lt.s32.totalorder %s1716_s22, %s1716_s22 }
  0x11   : > { %p1707_p8 = pneg %p1923_p7 }
  0x12   : > { %p1726_p0 = por %p1725_p13, %p1724_p12 }
  0x13   : > { %p1719_p10 = pnand %p1717_p9, %p1707_p8 }
  0x15   : > { %p1720_p11 = pneg %p1719_p10 }
  0x17   : > { %p1727_p2 = pnand %p1726_p0, %p1720_p11 }
  0x19   : > { %1730 = shalt.err (!%p1727_p2)
}
  0x1a   : > { %s1827_s23 = smov 256   ;;  %s1828_s24 = smov 16  }
  0x1b   : > { %1647 = dma.hbm_to_vmem [thread:$0]  (!%p1923_p7), %s2168_s1, 24576, %s262_s18, [#allocation8], %s1827_s23, %s1827_s23, %s1828_s24  }
  0x1c   : > { %s1742_s27 = scalar_lea.vmem %s284_s21, 24576  ;;  %p1750_p10 = scmp.lt.s32.totalorder %s284_s21, %s284_s21 }
  0x1d   : > { %p1743_p3 = scmp.ne.s32.totalorder %s284_s21, %s1742_s27  ;;  %p1751_p11 = scmp.lt.s32.totalorder %s1742_s27, %s1742_s27 }
  0x1f   : > { %p1745_p6 = pnand %p1743_p3, %p1707_p8  ;;  %p1752_p12 = por %p1751_p11, %p1750_p10 }
  0x21   : > { %p1746_p9 = pneg %p1745_p6 }
  0x23   : > { %p1753_p13 = pnand %p1752_p12, %p1746_p9 }
  0x25   : > { %1756 = shalt.err (!%p1753_p13)
}
  0x26   : > { %1650 = dma.hbm_to_vmem [thread:$0]  (!%p1923_p7), %s2172_s5, 24576, %s284_s21, [#allocation8], %s1827_s23, %s1827_s23, %s1828_s24  }
  0x27   : > { %s1952_s30 = sadd.s32 1, %s1823_s14   ;;  %s31_s10 = sadd.s32 1, %s1819_s13 }
  0x28   : > { %s28_s11 = ssub.s32 %s1823_s14, %s1952_s30  ;;  %p38_p8 = scmp.ne.s32.totalorder %s1819_s13, %s1815_s12 }
  0x29   : > { %p29_p0 = scmp.eq.s32.totalorder %s28_s11, 0  ;;  %p39_p2 = scmp.eq.s32.totalorder %s1823_s14, 0 }
  0x2a   : > { %p1657_p3 = scmp.lt.s32.totalorder %s1823_s14, 2  ;;  %s306_s17 = sand.u32 1, %s1819_s13  }
  0x2b   : > { %s1963_s18 = scalar_select %p29_p0, %s1819_s13, %s31_s10  }
  0x2c   : > { %p40_p6 = por %p39_p2, %p38_p8  ;;  %s1621_s19 = sshll.u32 %s306_s17, 5 }
  0x2d   : > { %s1632_s20 = sshll.u32 %s1823_s14, 9  ;;  %s310_s21 = scalar_lea.vmem [#allocation5], %s1621_s19 }
  0x2e   : > { %s1969_s26 = scalar_lea.hbm %s2167_s0, %s1632_s20  ;;  %s317_s27 = sshll.u32 %s310_s21, 4  ;;  %s1975_s27 = int_to_ptr.vmem [resolvable:$true] %s317_s27 }
  0x2f   : > { %p1971_p7 = pnand %p1657_p3, %p40_p6  ;;  %s1977_s29 = scalar_lea.sflag [#allocation6], %s306_s17 }
  0x30   : > { %s1757_s14 = scalar_lea.hbm %s1969_s26, 512  ;;  %s1762_s19 = scalar_lea.hbm %s2167_s0, 1024 }
  0x31   : > { %p1758_p9 = scmp.ne.s32.totalorder %s1969_s26, %s1757_s14  ;;  %p1759_p10 = pneg %p1971_p7 }
  0x32   : > { %p1763_p13 = scmp.lt.s32.totalorder %s1969_s26, %s2167_s0  ;;  %p1764_p8 = scmp.lt.s32.totalorder %s1762_s19, %s1757_s14 }
  0x33   : > { %p1760_p11 = pnand %p1759_p10, %p1758_p9 }
  0x34   : > { %p1765_p0 = por %p1764_p8, %p1763_p13 }
  0x35   : > { %p1761_p12 = pneg %p1760_p11 }
  0x37   : > { %p1766_p2 = pnand %p1765_p0, %p1761_p12 }
  0x39   : > { %1769 = shalt.err (!%p1766_p2)
}
  0x3a   : > { %s1770_s17 = scalar_lea.vmem %s1975_s27, 512  ;;  %s1829_s25 = smov [#allocation5]  }
  0x3b   : > { %p1771_p3 = scmp.ne.s32.totalorder %s1975_s27, %s1770_s17  ;;  %s1775_s21 = sshll.u32 %s1829_s25, 4  ;;  %s1776_s21 = int_to_ptr.vmem [resolvable:$false] %s1775_s21 }
  0x3c   : > { %s1777_s10 = scalar_lea.vmem %s1776_s21, 1024  ;;  %p1778_p11 = scmp.lt.s32.totalorder %s1975_s27, %s1776_s21 }
  0x3d   : > { %p1773_p6 = pnand %p1771_p3, %p1759_p10  ;;  %p1779_p1 = scmp.lt.s32.totalorder %s1777_s10, %s1770_s17 }
  0x3f   : > { %p1774_p9 = pneg %p1773_p6  ;;  %p1780_p4 = por %p1779_p1, %p1778_p11 }
  0x41   : > { %p1781_p5 = pnand %p1780_p4, %p1774_p9 }
  0x43   : > { %1784 = shalt.err (!%p1781_p5)
}
  0x44   : > { %1654 = dma.hbm_to_vmem [thread:$0]  (!%p1971_p7), %s1969_s26, 512, %s1975_s27, %s1977_s29, %s1827_s23, %s1827_s23, %s1828_s24  }
  0x45   : > { %p2184_p10 = scmp.ne.s32.totalorder %s2181_s16, 0 }
  0x46   : > { %s331_s14 = sand.u32 (!%p2184_p10), 1, %s1815_s12   ;;  %p2185_p1 = scmp.ne.s32.totalorder (!%p2184_p10), %s2180_s15, 0 }
  0x47   : > { %329 = sbr.rel (%p2184_p10) target bundleno = 1444 (0x5a4), region = 56  ;;  %s1625_s11 = sshll.u32 (!%p2184_p10), %s331_s14, 5 }
  0x48   : > { %s332_s19 = scalar_lea.sflag (!%p2184_p10), [#allocation6], %s331_s14  ;;  %s2004_s20 = scalar_lea.vmem (!%p2184_p10), [#allocation5], %s1625_s11 }
  0x4c   : > { %1802 = dma.done.wait (%p2185_p1), %s332_s19, 512  }
  0x4d   : > { %1804 = vsyncadd (%p2185_p1), %s332_s19, 4294966784  ;;  %p2186_p4 = scmp.eq.s32.totalorder %s1903_s8, 0 }
  0x4f   : > { %1806 = dma.done.wait (%p2186_p4), [#allocation8], 49152   ;;  %p2187_p5 = pmov %p2186_p4 }
  0x50   : > { %v387_v0 = vlaneseq  ;;  %v1830_v1 = vmov 0.0   ;;  %v519_v2 = vld [vmem:[#allocation7 + $0x2f8] sm:$0xff]  ;;  %v518_v4 = vld [vmem:[#allocation7 + $0x2f0] sm:$0xff]  ;;  %v517_v6 = vld [vmem:[#allocation7 + $0x2e8] sm:$0xff]  ;;  %vm400_vm1 = vcmask 1040384   ;;  %vm783_vm2 = vcmask 1045504  }
  0x51   : > { %1808 = vsyncadd (%p2187_p5), [#allocation8], 4294918144  ;;  %v454_v3 = vld [vmem:[#allocation7 + $0xf8] sm:$0xff]  ;;  %552 = vmatprep.subr.mxu0 %v519_v2  ;;  %v453_v5 = vld [vmem:[#allocation7 + $0xf0] sm:$0xff]  ;;  %p378_p7 = scmp.lt.s32.totalorder %s1903_s8, 1  ;;  %s1523_s25 = sld [smem:[#allocation4]] }
  0x52   : > { %vm389_vm0 = vcmp.lt.s32.totalorder %v387_v0, 256  ;;  %629 = vmatprep.subr.mxu1 %v454_v3  ;;  %v452_v7 = vld [vmem:[#allocation7 + $0xe8] sm:$0xff]  ;;  %553 = vmatpush1.msra.mxu0 %v518_v4  ;;  %v516_v8 = vld [vmem:[#allocation7 + $0x2e0] sm:$0xff]  ;;  %v515_v10 = vld [vmem:[#allocation7 + $0x2d8] sm:$0xff]  ;;  %vm1527_vm3 = vcmask 7168  }
  0x53   : > { %391 = vst.msk [vmem:[#allocation2] ss:$8 sm:$0x3] %vm389_vm0, %v1830_v1  ;;  %394 = vst.msk [vmem:[#allocation2 + $0x21] ss:$8 sm:$0x3] %vm389_vm0, %v1830_v1  ;;  %630 = vmatpush1.msra.mxu1 %v453_v5  ;;  %554 = vmatprep.subr.mxu0 %v517_v6 }
  0x54   : > { %963 = vst.msk [vmem:[#allocation3] ss:$8 sm:$0x3] %vm389_vm0, %v1830_v1  ;;  %966 = vst.msk [vmem:[#allocation3 + $0x21] ss:$8 sm:$0x3] %vm389_vm0, %v1830_v1  ;;  %631 = vmatprep.subr.mxu1 %v452_v7  ;;  %555 = vmatpush1.msra.mxu0 %v516_v8 }
  0x55   : > { %v451_v9 = vld [vmem:[#allocation7 + $0xe0] sm:$0xff]  ;;  %v450_v11 = vld [vmem:[#allocation7 + $0xd8] sm:$0xff]  ;;  %v514_v12 = vld [vmem:[#allocation7 + $0x2d0] sm:$0xff]  ;;  %556 = vmatprep.subr.mxu0 %v515_v10  ;;  %s2193_s8 = smov (!%p378_p7, %s1903_s8), 1 }
  0x56   : > { %v449_v13 = vld [vmem:[#allocation7 + $0xd0] sm:$0xff]  ;;  %632 = vmatpush1.msra.mxu1 %v451_v9  ;;  %v513_v14 = vld [vmem:[#allocation7 + $0x2c8] sm:$0xff]  ;;  %v512_v16 = vld [vmem:[#allocation7 + $0x2c0] sm:$0xff]  ;;  %557 = vmatpush1.msra.mxu0 %v514_v12  ;;  %s1633_s21 = sshll.u32 %s2193_s8, 4 }
  0x57   : > { %v448_v15 = vld [vmem:[#allocation7 + $0xc8] sm:$0xff]  ;;  %633 = vmatprep.subr.mxu1 %v450_v11  ;;  %v447_v17 = vld [vmem:[#allocation7 + $0xc0] sm:$0xff]  ;;  %v511_v18 = vld [vmem:[#allocation7 + $0x2b8] sm:$0xff]  ;;  %558 = vmatprep.subr.mxu0 %v513_v14  ;;  %s382_s11 = scalar_lea.vmem %s2176_s9, %s1633_s21 }
  0x58   : > { %634 = vmatpush1.msra.mxu1 %v449_v13  ;;  %v446_v19 = vld [vmem:[#allocation7 + $0xb8] sm:$0xff]  ;;  %v510_v20 = vld [vmem:[#allocation7 + $0x2b0] sm:$0xff]  ;;  %559 = vmatpush1.msra.mxu0 %v512_v16  ;;  %v509_v22 = vld [vmem:[#allocation7 + $0x2a8] sm:$0xff] }
  0x59   : > { %635 = vmatprep.subr.mxu1 %v448_v15  ;;  %v445_v21 = vld [vmem:[#allocation7 + $0xb0] sm:$0xff]  ;;  %v444_v23 = vld [vmem:[#allocation7 + $0xa8] sm:$0xff]  ;;  %560 = vmatprep.subr.mxu0 %v511_v18  ;;  %v508_v24 = vld [vmem:[#allocation7 + $0x2a0] sm:$0xff] }
  0x5a   : > { %636 = vmatpush1.msra.mxu1 %v447_v17  ;;  %v443_v25 = vld [vmem:[#allocation7 + $0xa0] sm:$0xff]  ;;  %561 = vmatpush1.msra.mxu0 %v510_v20  ;;  %v507_v26 = vld [vmem:[#allocation7 + $0x298] sm:$0xff]  ;;  %v506_v28 = vld [vmem:[#allocation7 + $0x290] sm:$0xff] }
  0x5b   : > { %637 = vmatprep.subr.mxu1 %v446_v19  ;;  %v442_v27 = vld [vmem:[#allocation7 + $0x98] sm:$0xff]  ;;  %562 = vmatprep.subr.mxu0 %v509_v22  ;;  %v441_v29 = vld [vmem:[#allocation7 + $0x90] sm:$0xff]  ;;  %v505_v30 = vld [vmem:[#allocation7 + $0x288] sm:$0xff] }
  0x5c   : > { %638 = vmatpush1.msra.mxu1 %v445_v21  ;;  %563 = vmatpush1.msra.mxu0 %v508_v24  ;;  %v440_v31 = vld [vmem:[#allocation7 + $0x88] sm:$0xff]  ;;  %v504_v32 = vld [vmem:[#allocation7 + $0x280] sm:$0xff]  ;;  %v503_v34 = vld [vmem:[#allocation7 + $0x278] sm:$0xff] }
  0x5d   : > { %639 = vmatprep.subr.mxu1 %v444_v23  ;;  %564 = vmatprep.subr.mxu0 %v507_v26  ;;  %v439_v33 = vld [vmem:[#allocation7 + $0x80] sm:$0xff]  ;;  %v438_v35 = vld [vmem:[#allocation7 + $0x78] sm:$0xff]  ;;  %v502_v36 = vld [vmem:[#allocation7 + $0x270] sm:$0xff] }
  0x5e   : > { %640 = vmatpush1.msra.mxu1 %v443_v25  ;;  %565 = vmatpush1.msra.mxu0 %v506_v28  ;;  %v437_v37 = vld [vmem:[#allocation7 + $0x70] sm:$0xff]  ;;  %v501_v38 = vld [vmem:[#allocation7 + $0x268] sm:$0xff]  ;;  %v500_v40 = vld [vmem:[#allocation7 + $0x260] sm:$0xff] }
  0x5f   : > { %641 = vmatprep.subr.mxu1 %v442_v27  ;;  %566 = vmatprep.subr.mxu0 %v505_v30  ;;  %v436_v39 = vld [vmem:[#allocation7 + $0x68] sm:$0xff]  ;;  %v435_v41 = vld [vmem:[#allocation7 + $0x60] sm:$0xff]  ;;  %v499_v42 = vld [vmem:[#allocation7 + $0x258] sm:$0xff] }
  0x60   : > { %642 = vmatpush1.msra.mxu1 %v441_v29  ;;  %567 = vmatpush1.msra.mxu0 %v504_v32  ;;  %v434_v43 = vld [vmem:[#allocation7 + $0x58] sm:$0xff]  ;;  %v498_v44 = vld [vmem:[#allocation7 + $0x250] sm:$0xff]  ;;  %v497_v46 = vld [vmem:[#allocation7 + $0x248] sm:$0xff] }
  0x61   : > { %643 = vmatprep.subr.mxu1 %v440_v31  ;;  %568 = vmatprep.subr.mxu0 %v503_v34  ;;  %v433_v45 = vld [vmem:[#allocation7 + $0x50] sm:$0xff]  ;;  %v432_v47 = vld [vmem:[#allocation7 + $0x48] sm:$0xff]  ;;  %v496_v48 = vld [vmem:[#allocation7 + $0x240] sm:$0xff] }
  0x62   : > { %644 = vmatpush1.msra.mxu1 %v439_v33  ;;  %569 = vmatpush1.msra.mxu0 %v502_v36  ;;  %v431_v49 = vld [vmem:[#allocation7 + $0x40] sm:$0xff]  ;;  %v495_v50 = vld [vmem:[#allocation7 + $0x238] sm:$0xff]  ;;  %v494_v52 = vld [vmem:[#allocation7 + $0x230] sm:$0xff] }
  0x63   : > { %645 = vmatprep.subr.mxu1 %v438_v35  ;;  %570 = vmatprep.subr.mxu0 %v501_v38  ;;  %v430_v51 = vld [vmem:[#allocation7 + $0x38] sm:$0xff]  ;;  %v429_v53 = vld [vmem:[#allocation7 + $0x30] sm:$0xff]  ;;  %v493_v54 = vld [vmem:[#allocation7 + $0x228] sm:$0xff] }
  0x64   : > { %646 = vmatpush1.msra.mxu1 %v437_v37  ;;  %571 = vmatpush1.msra.mxu0 %v500_v40  ;;  %v428_v55 = vld [vmem:[#allocation7 + $0x28] sm:$0xff]  ;;  %v492_v56 = vld [vmem:[#allocation7 + $0x220] sm:$0xff]  ;;  %v491_v58 = vld [vmem:[#allocation7 + $0x218] sm:$0xff] }
  0x65   : > { %647 = vmatprep.subr.mxu1 %v436_v39  ;;  %572 = vmatprep.subr.mxu0 %v499_v42  ;;  %v427_v57 = vld [vmem:[#allocation7 + $0x20] sm:$0xff]  ;;  %v426_v59 = vld [vmem:[#allocation7 + $0x18] sm:$0xff]  ;;  %v490_v60 = vld [vmem:[#allocation7 + $0x210] sm:$0xff] }
  0x66   : > { %648 = vmatpush1.msra.mxu1 %v435_v41  ;;  %573 = vmatpush1.msra.mxu0 %v498_v44  ;;  %v425_v61 = vld [vmem:[#allocation7 + $0x10] sm:$0xff]  ;;  %v489_v62 = vld [vmem:[#allocation7 + $0x208] sm:$0xff]  ;;  %v488_v1 = vld [vmem:[#allocation7 + $0x200] sm:$0xff] }
  0x67   : > { %649 = vmatprep.subr.mxu1 %v434_v43  ;;  %574 = vmatprep.subr.mxu0 %v497_v46  ;;  %v424_v63 = vld [vmem:[#allocation7 + $0x8] sm:$0xff]  ;;  %v423_v2 = vld [vmem:[#allocation7] sm:$0xff]  ;;  %v551_v3 = vld [vmem:[#allocation7 + $0x3f8] sm:$0xff] }
  0x68   : > { %650 = vmatpush1.msra.mxu1 %v433_v45  ;;  %575 = vmatpush1.msra.mxu0 %v496_v48  ;;  %v486_v4 = vld [vmem:[#allocation7 + $0x1f8] sm:$0xff]  ;;  %v550_v5 = vld [vmem:[#allocation7 + $0x3f0] sm:$0xff]  ;;  %v549_v7 = vld [vmem:[#allocation7 + $0x3e8] sm:$0xff] }
  0x69   : > { %651 = vmatprep.subr.mxu1 %v432_v47  ;;  %576 = vmatprep.subr.mxu0 %v495_v50  ;;  %v485_v6 = vld [vmem:[#allocation7 + $0x1f0] sm:$0xff]  ;;  %v484_v8 = vld [vmem:[#allocation7 + $0x1e8] sm:$0xff]  ;;  %v548_v9 = vld [vmem:[#allocation7 + $0x3e0] sm:$0xff] }
  0x6a   : > { %652 = vmatpush1.msra.mxu1 %v431_v49  ;;  %577 = vmatpush1.msra.mxu0 %v494_v52  ;;  %v483_v10 = vld [vmem:[#allocation7 + $0x1e0] sm:$0xff]  ;;  %v547_v11 = vld [vmem:[#allocation7 + $0x3d8] sm:$0xff]  ;;  %v546_v13 = vld [vmem:[#allocation7 + $0x3d0] sm:$0xff] }
  0x6b   : > { %653 = vmatprep.subr.mxu1 %v430_v51  ;;  %578 = vmatprep.subr.mxu0 %v493_v54  ;;  %v482_v12 = vld [vmem:[#allocation7 + $0x1d8] sm:$0xff]  ;;  %v481_v14 = vld [vmem:[#allocation7 + $0x1d0] sm:$0xff]  ;;  %v545_v15 = vld [vmem:[#allocation7 + $0x3c8] sm:$0xff] }
  0x6c   : > { %654 = vmatpush1.msra.mxu1 %v429_v53  ;;  %579 = vmatpush1.msra.mxu0 %v492_v56  ;;  %v480_v16 = vld [vmem:[#allocation7 + $0x1c8] sm:$0xff]  ;;  %v544_v17 = vld [vmem:[#allocation7 + $0x3c0] sm:$0xff]  ;;  %v543_v19 = vld [vmem:[#allocation7 + $0x3b8] sm:$0xff] }
  0x6d   : > { %655 = vmatprep.subr.mxu1 %v428_v55  ;;  %580 = vmatprep.subr.mxu0 %v491_v58  ;;  %v479_v18 = vld [vmem:[#allocation7 + $0x1c0] sm:$0xff]  ;;  %v478_v20 = vld [vmem:[#allocation7 + $0x1b8] sm:$0xff]  ;;  %v542_v21 = vld [vmem:[#allocation7 + $0x3b0] sm:$0xff] }
  0x6e   : > { %656 = vmatpush1.msra.mxu1 %v427_v57  ;;  %581 = vmatpush1.msra.mxu0 %v490_v60  ;;  %v477_v22 = vld [vmem:[#allocation7 + $0x1b0] sm:$0xff]  ;;  %v541_v23 = vld [vmem:[#allocation7 + $0x3a8] sm:$0xff]  ;;  %v540_v25 = vld [vmem:[#allocation7 + $0x3a0] sm:$0xff] }
  0x6f   : > { %657 = vmatprep.subr.mxu1 %v426_v59  ;;  %582 = vmatprep.subr.mxu0 %v489_v62  ;;  %v476_v24 = vld [vmem:[#allocation7 + $0x1a8] sm:$0xff]  ;;  %v475_v26 = vld [vmem:[#allocation7 + $0x1a0] sm:$0xff]  ;;  %v539_v27 = vld [vmem:[#allocation7 + $0x398] sm:$0xff] }
  0x70   : > { %658 = vmatpush1.msra.mxu1 %v425_v61  ;;  %583 = vmatpush1.msra.mxu0 %v488_v1  ;;  %v474_v28 = vld [vmem:[#allocation7 + $0x198] sm:$0xff]  ;;  %v2016_v29 = vld [vmem:[%s2004_s20 + $0x8] sm:$0xff]  ;;  %v538_v30 = vld [vmem:[#allocation7 + $0x390] sm:$0xff] }
  0x71   : > { %659 = vmatprep.subr.mxu1 %v424_v63  ;;  %584 = vmatprep.subr.mxu0 %v551_v3  ;;  %v473_v31 = vld [vmem:[#allocation7 + $0x190] sm:$0xff]  ;;  %v402_v32 = vrot.slane %v2016_v29, 7  ;;  %v2020_v33 = vld [vmem:[%s2004_s20] sm:$0xff]  ;;  %v537_v34 = vld [vmem:[#allocation7 + $0x388] sm:$0xff] }
  0x72   : > { %660 = vmatpush1.msra.mxu1 %v423_v2  ;;  %585 = vmatpush2.msra.mxu0 %v550_v5  ;;  %v472_v35 = vld [vmem:[#allocation7 + $0x188] sm:$0xff]  ;;  %v401_v36 = vrot.slane %v2020_v33, 7  ;;  %v536_v37 = vld [vmem:[#allocation7 + $0x380] sm:$0xff]  ;;  %v535_v39 = vld [vmem:[#allocation7 + $0x378] sm:$0xff] }
  0x73   : > { %661 = vmatprep.subr.mxu1 %v486_v4  ;;  %586 = vmatprep.subr.mxu0 %v549_v7  ;;  %v471_v38 = vld [vmem:[#allocation7 + $0x180] sm:$0xff]  ;;  %414 = vst [vmem:[#allocation2 + $0x8] sm:$0xfe] %v402_v32  ;;  %v470_v40 = vld [vmem:[#allocation7 + $0x178] sm:$0xff]  ;;  %v534_v41 = vld [vmem:[#allocation7 + $0x370] sm:$0xff] }
  0x74   : > { %662 = vmatpush2.msra.mxu1 %v485_v6  ;;  %587 = vmatpush2.msra.mxu0 %v548_v9  ;;  %413 = vst [vmem:[#allocation2] sm:$0xfe] %v401_v36  ;;  %v469_v42 = vld [vmem:[#allocation7 + $0x170] sm:$0xff]  ;;  %v533_v43 = vld [vmem:[#allocation7 + $0x368] sm:$0xff]  ;;  %v532_v45 = vld [vmem:[#allocation7 + $0x360] sm:$0xff] }
  0x75   : > { %663 = vmatprep.subr.mxu1 %v484_v8  ;;  %588 = vmatprep.subr.mxu0 %v547_v11  ;;  %v468_v44 = vld [vmem:[#allocation7 + $0x168] sm:$0xff]  ;;  %v467_v46 = vld [vmem:[#allocation7 + $0x160] sm:$0xff]  ;;  %v531_v47 = vld [vmem:[#allocation7 + $0x358] sm:$0xff] }
  0x76   : > { %664 = vmatpush2.msra.mxu1 %v483_v10  ;;  %589 = vmatpush2.msra.mxu0 %v546_v13  ;;  %v466_v48 = vld [vmem:[#allocation7 + $0x158] sm:$0xff]  ;;  %v530_v49 = vld [vmem:[#allocation7 + $0x350] sm:$0xff]  ;;  %v529_v51 = vld [vmem:[#allocation7 + $0x348] sm:$0xff] }
  0x77   : > { %665 = vmatprep.subr.mxu1 %v482_v12  ;;  %590 = vmatprep.subr.mxu0 %v545_v15  ;;  %v465_v50 = vld [vmem:[#allocation7 + $0x150] sm:$0xff]  ;;  %v464_v52 = vld [vmem:[#allocation7 + $0x148] sm:$0xff]  ;;  %v528_v53 = vld [vmem:[#allocation7 + $0x340] sm:$0xff] }
  0x78   : > { %666 = vmatpush2.msra.mxu1 %v481_v14  ;;  %591 = vmatpush2.msra.mxu0 %v544_v17  ;;  %v463_v54 = vld [vmem:[#allocation7 + $0x140] sm:$0xff]  ;;  %v527_v55 = vld [vmem:[#allocation7 + $0x338] sm:$0xff]  ;;  %v526_v57 = vld [vmem:[#allocation7 + $0x330] sm:$0xff] }
  0x79   : > { %667 = vmatprep.subr.mxu1 %v480_v16  ;;  %592 = vmatprep.subr.mxu0 %v543_v19  ;;  %v462_v56 = vld [vmem:[#allocation7 + $0x138] sm:$0xff]  ;;  %v461_v58 = vld [vmem:[#allocation7 + $0x130] sm:$0xff]  ;;  %v525_v59 = vld [vmem:[#allocation7 + $0x328] sm:$0xff] }
  0x7a   : > { %668 = vmatpush2.msra.mxu1 %v479_v18  ;;  %593 = vmatpush2.msra.mxu0 %v542_v21  ;;  %v460_v60 = vld [vmem:[#allocation7 + $0x128] sm:$0xff]  ;;  %v524_v61 = vld [vmem:[#allocation7 + $0x320] sm:$0xff]  ;;  %v523_v63 = vld [vmem:[#allocation7 + $0x318] sm:$0xff] }
  0x7b   : > { %669 = vmatprep.subr.mxu1 %v478_v20  ;;  %594 = vmatprep.subr.mxu0 %v541_v23  ;;  %v459_v62 = vld [vmem:[#allocation7 + $0x120] sm:$0xff]  ;;  %v458_v1 = vld [vmem:[#allocation7 + $0x118] sm:$0xff]  ;;  %v522_v2 = vld [vmem:[#allocation7 + $0x310] sm:$0xff] }
  0x7c   : > { %670 = vmatpush2.msra.mxu1 %v477_v22  ;;  %595 = vmatpush2.msra.mxu0 %v540_v25  ;;  %v457_v3 = vld [vmem:[#allocation7 + $0x110] sm:$0xff]  ;;  %v521_v4 = vld [vmem:[#allocation7 + $0x308] sm:$0xff]  ;;  %v520_v6 = vld [vmem:[#allocation7 + $0x300] sm:$0xff] }
  0x7d   : > { %671 = vmatprep.subr.mxu1 %v476_v24  ;;  %596 = vmatprep.subr.mxu0 %v539_v27  ;;  %v456_v5 = vld [vmem:[#allocation7 + $0x108] sm:$0xff]  ;;  %v455_v7 = vld [vmem:[#allocation7 + $0x100] sm:$0xff]  ;;  %v386_v10 = vld [vmem:[%s2004_s20 + $0x18] sm:$0xff] }
  0x7e   : > { %672 = vmatpush2.msra.mxu1 %v475_v26  ;;  %597 = vmatpush2.msra.mxu0 %v538_v30  ;;  %v420_v8 = vld [vmem:[#allocation2 + $0x8] sm:$0xff]  ;;  %v419_v9 = vld [vmem:[#allocation2] sm:$0xff]  ;;  %v385_v11 = vld [vmem:[%s2004_s20 + $0x10] sm:$0xff]  ;;  %v405_v13 = vrot.slane %v386_v10, 7 }
  0x7f   : > { %673 = vmatprep.subr.mxu1 %v474_v28  ;;  %598 = vmatprep.subr.mxu0 %v537_v34  ;;  %v744_v12 = vld [vmem:[#allocation7 + $0x4f8] sm:$0xff]  ;;  %v403_v14 = vrot.slane %v385_v11, 7  ;;  %v743_v15 = vld [vmem:[#allocation7 + $0x4f0] sm:$0xff]  ;;  %v742_v16 = vld [vmem:[#allocation7 + $0x4e8] sm:$0xff] }
  0x80   : > { %674 = vmatpush2.msra.mxu1 %v473_v31  ;;  %599 = vmatpush2.msra.mxu0 %v536_v37  ;;  %v2034_v17 = vsel %vm400_vm1, %v402_v32, %v405_v13  ;;  %418 = vst [vmem:[#allocation2 + $0x28] sm:$0x1] %v405_v13  ;;  %v707_v19 = vld [vmem:[#allocation2 + $0x8] sm:$0xfc]  ;;  %v741_v20 = vld [vmem:[#allocation7 + $0x4e0] sm:$0xff]  ;;  %v740_v23 = vld [vmem:[#allocation7 + $0x4d8] sm:$0xff] }
  0x81   : > { %675 = vmatprep.subr.mxu1 %v472_v35  ;;  %600 = vmatprep.subr.mxu0 %v535_v39  ;;  %v2039_v18 = vsel %vm400_vm1, %v401_v36, %v403_v14  ;;  %417 = vst [vmem:[#allocation2 + $0x20] sm:$0x1] %v403_v14  ;;  %v787_v21 = vrot.slane %v707_v19, 2  ;;  %v788_v22 = vrot.slane %v2034_v17, 2  ;;  %v739_v24 = vld [vmem:[#allocation7 + $0x4d0] sm:$0xff]  ;;  %v738_v26 = vld [vmem:[#allocation7 + $0x4c8] sm:$0xff] }
  0x82   : > { %676 = vmatpush2.msra.mxu1 %v471_v38  ;;  %601 = vmatpush2.msra.mxu0 %v534_v41  ;;  %v737_v27 = vld [vmem:[#allocation7 + $0x4c0] sm:$0xff]  ;;  %v736_v28 = vld [vmem:[#allocation7 + $0x4b8] sm:$0xff]  ;;  %v734_v30 = vld [vmem:[#allocation7 + $0x4a8] sm:$0xff] }
  0x83   : > { %677 = vmatprep.subr.mxu1 %v470_v40  ;;  %602 = vmatprep.subr.mxu0 %v533_v43  ;;  %v789_v25 = vsel %vm783_vm2, %v787_v21, %v788_v22  ;;  %v733_v31 = vld [vmem:[#allocation7 + $0x4a0] sm:$0xff]  ;;  %v732_v32 = vld [vmem:[#allocation7 + $0x498] sm:$0xff]  ;;  %v730_v34 = vld [vmem:[#allocation7 + $0x488] sm:$0xff] }
  0x84   : > { %678 = vmatpush2.msra.mxu1 %v469_v42  ;;  %603 = vmatpush2.msra.mxu0 %v532_v45  ;;  %v729_v35 = vld [vmem:[#allocation7 + $0x480] sm:$0xff]  ;;  %v728_v36 = vld [vmem:[#allocation7 + $0x478] sm:$0xff]  ;;  %v727_v37 = vld [vmem:[#allocation7 + $0x470] sm:$0xff] }
  0x85   : > { %679 = vmatprep.subr.mxu1 %v468_v44  ;;  %604 = vmatprep.subr.mxu0 %v531_v47  ;;  %v726_v38 = vld [vmem:[#allocation7 + $0x468] sm:$0xff]  ;;  %v725_v39 = vld [vmem:[#allocation7 + $0x460] sm:$0xff]  ;;  %v724_v40 = vld [vmem:[#allocation7 + $0x458] sm:$0xff] }
  0x86   : > { %680 = vmatpush2.msra.mxu1 %v467_v46  ;;  %605 = vmatpush2.msra.mxu0 %v530_v49  ;;  %v723_v41 = vld [vmem:[#allocation7 + $0x450] sm:$0xff]  ;;  %v722_v42 = vld [vmem:[#allocation7 + $0x448] sm:$0xff]  ;;  %v721_v43 = vld [vmem:[#allocation7 + $0x440] sm:$0xff] }
  0x87   : > { %681 = vmatprep.subr.mxu1 %v466_v48  ;;  %606 = vmatprep.subr.mxu0 %v529_v51  ;;  %v720_v44 = vld [vmem:[#allocation7 + $0x438] sm:$0xff]  ;;  %v719_v45 = vld [vmem:[#allocation7 + $0x430] sm:$0xff]  ;;  %v718_v46 = vld [vmem:[#allocation7 + $0x428] sm:$0xff] }
  0x88   : > { %682 = vmatpush2.msra.mxu1 %v465_v50  ;;  %607 = vmatpush2.msra.mxu0 %v528_v53  ;;  %v717_v47 = vld [vmem:[#allocation7 + $0x420] sm:$0xff]  ;;  %v716_v48 = vld [vmem:[#allocation7 + $0x418] sm:$0xff]  ;;  %v715_v49 = vld [vmem:[#allocation7 + $0x410] sm:$0xff] }
  0x89   : > { %683 = vmatprep.subr.mxu1 %v464_v52  ;;  %608 = vmatprep.subr.mxu0 %v527_v55  ;;  %v714_v50 = vld [vmem:[#allocation7 + $0x408] sm:$0xff]  ;;  %v713_v51 = vld [vmem:[#allocation7 + $0x400] sm:$0xff]  ;;  %v776_v52 = vld [vmem:[#allocation7 + $0x5f8] sm:$0xff] }
  0x8a   : > { %684 = vmatpush2.msra.mxu1 %v463_v54  ;;  %609 = vmatpush2.msra.mxu0 %v526_v57  ;;  %v775_v53 = vld [vmem:[#allocation7 + $0x5f0] sm:$0xff]  ;;  %v774_v54 = vld [vmem:[#allocation7 + $0x5e8] sm:$0xff]  ;;  %v773_v55 = vld [vmem:[#allocation7 + $0x5e0] sm:$0xff] }
  0x8b   : > { %685 = vmatprep.subr.mxu1 %v462_v56  ;;  %610 = vmatprep.subr.mxu0 %v525_v59  ;;  %v772_v56 = vld [vmem:[#allocation7 + $0x5d8] sm:$0xff]  ;;  %v771_v57 = vld [vmem:[#allocation7 + $0x5d0] sm:$0xff]  ;;  %v769_v59 = vld [vmem:[#allocation7 + $0x5c0] sm:$0xff] }
  0x8c   : > { %686 = vmatpush2.msra.mxu1 %v461_v58  ;;  %611 = vmatpush2.msra.mxu0 %v524_v61  ;;  %v770_v58 = vld [vmem:[#allocation7 + $0x5c8] sm:$0xff]  ;;  %v767_v61 = vld [vmem:[#allocation7 + $0x5b0] sm:$0xff]  ;;  %v752_v13 = vld [vmem:[#allocation7 + $0x538] sm:$0xff] }
  0x8d   : > { %687 = vmatprep.subr.mxu1 %v460_v60  ;;  %612 = vmatprep.subr.mxu0 %v523_v63  ;;  %v768_v60 = vld [vmem:[#allocation7 + $0x5b8] sm:$0xff]  ;;  %v765_v63 = vld [vmem:[#allocation7 + $0x5a0] sm:$0xff]  ;;  %v751_v14 = vld [vmem:[#allocation7 + $0x530] sm:$0xff] }
  0x8e   : > { %688 = vmatpush2.msra.mxu1 %v459_v62  ;;  %613 = vmatpush2.msra.mxu0 %v522_v2  ;;  %v766_v62 = vld [vmem:[#allocation7 + $0x5a8] sm:$0xff]  ;;  %v763_v2 = vld [vmem:[#allocation7 + $0x590] sm:$0xff]  ;;  %v748_v21 = vld [vmem:[#allocation7 + $0x518] sm:$0xff] }
  0x8f   : > { %689 = vmatprep.subr.mxu1 %v458_v1  ;;  %614 = vmatprep.subr.mxu0 %v521_v4  ;;  %v764_v1 = vld [vmem:[#allocation7 + $0x598] sm:$0xff]  ;;  %v761_v4 = vld [vmem:[#allocation7 + $0x580] sm:$0xff]  ;;  %v711_v19 = vld [vmem:[#allocation2 + $0x28] sm:$0x3] }
  0x90   : > { %690 = vmatpush2.msra.mxu1 %v457_v3  ;;  %615 = vmatpush2.msra.mxu0 %v520_v6  ;;  %v762_v3 = vld [vmem:[#allocation7 + $0x588] sm:$0xff]  ;;  %v759_v6 = vld [vmem:[#allocation7 + $0x570] sm:$0xff] }
  0x91   : > { %691 = vmatprep.subr.mxu1 %v456_v5  ;;  %616 = vmatprep.mubr.f32.mxu0 %v2016_v29  ;;  %v735_v29 = vld [vmem:[#allocation7 + $0x4b0] sm:$0xff]  ;;  %v760_v5 = vld [vmem:[#allocation7 + $0x578] sm:$0xff] }
  0x92   : > { %692 = vmatpush2.msra.mxu1 %v455_v7  ;;  %693 = vmatprep.mubr.f32.mxu1 %v420_v8  ;;  %v758_v7 = vld [vmem:[#allocation7 + $0x568] sm:$0xff]  ;;  %v757_v8 = vld [vmem:[#allocation7 + $0x560] sm:$0xff] }
  0x93   : > { %617 = vmatmul.mubr.f32.vlgmr.msra.gmra.mxu0 %v2020_v33  ;;  %694 = vmatmul.mubr.f32.vlgmr.msra.gmra.mxu1 %v419_v9  ;;  %v731_v33 = vld [vmem:[#allocation7 + $0x490] sm:$0xff]  ;;  %v756_v9 = vld [vmem:[#allocation7 + $0x558] sm:$0xff] }
  0x94   : > { %798 = vmatprep.subr.mxu0 %v744_v12  ;;  %622 = vmatprep.mubr.f32.mxu0 %v386_v10  ;;  %v755_v10 = vld [vmem:[#allocation7 + $0x550] sm:$0xff]  ;;  %v753_v12 = vld [vmem:[#allocation7 + $0x540] sm:$0xff] }
  0x95   : > { %799 = vmatpush1.msra.mxu0 %v743_v15  ;;  %699 = vmatprep.mubr.f32.mxu1 %v2034_v17  ;;  %v706_v15 = vld [vmem:[#allocation2] sm:$0xfc]  ;;  %v879_v17 = vld [vmem:[%s2169_s2] sm:$0x3] }
  0x96   : > { %800 = vmatprep.subr.mxu0 %v742_v16  ;;  %v750_v16 = vld [vmem:[#allocation7 + $0x528] sm:$0xff] }
  0x97   : > { %801 = vmatpush1.msra.mxu0 %v741_v20  ;;  %700 = vmatmul.mubr.f32.gmra.mxu1 %v2039_v18  ;;  %v749_v20 = vld [vmem:[#allocation7 + $0x520] sm:$0xff] }
  0x98   : > { %802 = vmatprep.subr.mxu0 %v740_v23  ;;  %623 = vmatmul.mubr.f32.gmra.mxu0 %v385_v11  ;;  %v754_v11 = vld [vmem:[#allocation7 + $0x548] sm:$0xff]  ;;  %v784_v23 = vrot.slane %v706_v15, 2  ;;  %v1022_v15 = vld [vmem:[#allocation9 + $0xe0] sm:$0xff] }
  0x99   : > { %803 = vmatpush1.msra.mxu0 %v739_v24  ;;  %862 = vmatprep.mubr.f32.mxu0 %v789_v25  ;;  %v785_v24 = vrot.slane %v2039_v18, 2  ;;  %v747_v25 = vld [vmem:[#allocation7 + $0x510] sm:$0xff] }
  0x9a   : > { %804 = vmatprep.subr.mxu0 %v738_v26  ;;  %v792_v26 = vrot.slane %v711_v19, 2  ;;  %v1081_v19 = vld [vmem:[#allocation9 + $0x2b0] sm:$0xff] }
  0x9b   : > { %805 = vmatpush1.msra.mxu0 %v737_v27  ;;  %v710_v27 = vld [vmem:[#allocation2 + $0x20] sm:$0x3] }
  0x9c   : > { %806 = vmatprep.subr.mxu0 %v736_v28  ;;  %v746_v28 = vld [vmem:[#allocation7 + $0x508] sm:$0xff] }
  0x9d   : > { %807 = vmatpush1.msra.mxu0 %v735_v29  ;;  %v745_v29 = vld [vmem:[#allocation7 + $0x500] sm:$0xff] }
  0x9e   : > { %808 = vmatprep.subr.mxu0 %v734_v30  ;;  %v786_v30 = vsel %vm783_vm2, %v784_v23, %v785_v24  ;;  %v1019_v23 = vld [vmem:[#allocation9 + $0xc8] sm:$0xff] }
  0x9f   : > { %809 = vmatpush1.msra.mxu0 %v733_v31  ;;  %v790_v31 = vrot.slane %v710_v27, 2  ;;  %v1017_v27 = vld [vmem:[#allocation9 + $0xb8] sm:$0xff] }
  0xa0   : > { %810 = vmatprep.subr.mxu0 %v732_v32  ;;  %v793_v32 = vsel %vm783_vm2, %v788_v22, %v792_v26  ;;  %v1078_v26 = vld [vmem:[#allocation9 + $0x298] sm:$0xff] }
  0xa1   : > { %811 = vmatpush1.msra.mxu0 %v731_v33  ;;  %v791_v18 = vsel %vm783_vm2, %v785_v24, %v790_v31  ;;  %v1079_v24 = vld [vmem:[#allocation9 + $0x2a0] sm:$0xff]  ;;  %v1015_v31 = vld [vmem:[#allocation9 + $0xa8] sm:$0xff] }
  0xa2   : > { %812 = vmatprep.subr.mxu0 %v730_v34  ;;  %v882_v34 = vshrl.u32 %v387_v0, 7 }
  0xa3   : > { %813 = vmatpush1.msra.mxu0 %v729_v35 }
  0xa4   : > { %814 = vmatprep.subr.mxu0 %v728_v36  ;;  %v2059_v22 = vsub.s32 1, %v882_v34 }
  0xa5   : > { %815 = vmatpush1.msra.mxu0 %v727_v37 }
  0xa6   : > { %816 = vmatprep.subr.mxu0 %v726_v38  ;;  %v2054_v38 = vsub.s32 0, %v882_v34  ;;  %v1013_v34 = vld [vmem:[#allocation9 + $0x98] sm:$0xff] }
  0xa7   : > { %817 = vmatpush1.msra.mxu0 %v725_v39 }
  0xa8   : > { %818 = vmatprep.subr.mxu0 %v724_v40 }
  0xa9   : > { %819 = vmatpush1.msra.mxu0 %v723_v41 }
  0xaa   : > { %820 = vmatprep.subr.mxu0 %v722_v42 }
  0xab   : > { %821 = vmatpush1.msra.mxu0 %v721_v43  ;;  %v884_v43 = vrot.slane %v879_v17, %v2054_v38 }
  0xac   : > { %822 = vmatprep.subr.mxu0 %v720_v44 }
  0xad   : > { %823 = vmatpush1.msra.mxu0 %v719_v45 }
  0xae   : > { %824 = vmatprep.subr.mxu0 %v718_v46  ;;  %v888_v46 = vrot.slane %v879_v17, %v2059_v22  ;;  %v1071_v17 = vld [vmem:[#allocation9 + $0x260] sm:$0xff] }
  0xaf   : > { %825 = vmatpush1.msra.mxu0 %v717_v47 }
  0xb0   : > { %826 = vmatprep.subr.mxu0 %v716_v48 }
  0xb1   : > { %827 = vmatpush1.msra.mxu0 %v715_v49 }
  0xb2   : > { %828 = vmatprep.subr.mxu0 %v714_v50 }
  0xb3   : > { %829 = vmatpush1.msra.mxu0 %v713_v51 }
  0xb4   : > { %830 = vmatprep.subr.mxu0 %v776_v52 }
  0xb5   : > { %831 = vmatpush2.msra.mxu0 %v775_v53 }
  0xb6   : > { %832 = vmatprep.subr.mxu0 %v774_v54 }
  0xb7   : > { %833 = vmatpush2.msra.mxu0 %v773_v55 }
  0xb8   : > { %834 = vmatprep.subr.mxu0 %v772_v56 }
  0xb9   : > { %835 = vmatpush2.msra.mxu0 %v771_v57 }
  0xba   : > { %836 = vmatprep.subr.mxu0 %v770_v58 }
  0xbb   : > { %837 = vmatpush2.msra.mxu0 %v769_v59 }
  0xbc   : > { %838 = vmatprep.subr.mxu0 %v768_v60 }
  0xbd   : > { %839 = vmatpush2.msra.mxu0 %v767_v61 }
  0xbe   : > { %840 = vmatprep.subr.mxu0 %v766_v62 }
  0xbf   : > { %841 = vmatpush2.msra.mxu0 %v765_v63 }
  0xc0   : > { %842 = vmatprep.subr.mxu0 %v764_v1 }
  0xc1   : > { %843 = vmatpush2.msra.mxu0 %v763_v2 }
  0xc2   : > { %844 = vmatprep.subr.mxu0 %v762_v3  ;;  %v1090_v3 = vld [vmem:[#allocation9 + $0x2f8] sm:$0xff] }
  0xc3   : > { %845 = vmatpush2.msra.mxu0 %v761_v4  ;;  %v1089_v4 = vld [vmem:[#allocation9 + $0x2f0] sm:$0xff]  ;;  %1123 = vmatprep.subr.mxu1 %v1090_v3 }
  0xc4   : > { %846 = vmatprep.subr.mxu0 %v760_v5  ;;  %v1088_v5 = vld [vmem:[#allocation9 + $0x2e8] sm:$0xff]  ;;  %1124 = vmatpush1.msra.mxu1 %v1089_v4  ;;  %v1061_v3 = vld [vmem:[#allocation9 + $0x210] sm:$0xff] }
  0xc5   : > { %847 = vmatpush2.msra.mxu0 %v759_v6  ;;  %v1087_v6 = vld [vmem:[#allocation9 + $0x2e0] sm:$0xff]  ;;  %1125 = vmatprep.subr.mxu1 %v1088_v5  ;;  %v1000_v4 = vld [vmem:[#allocation9 + $0x30] sm:$0xff]  ;;  %v1060_v5 = vld [vmem:[#allocation9 + $0x208] sm:$0xff] }
  0xc6   : > { %848 = vmatprep.subr.mxu0 %v758_v7  ;;  %v1086_v7 = vld [vmem:[#allocation9 + $0x2d8] sm:$0xff]  ;;  %1126 = vmatpush1.msra.mxu1 %v1087_v6  ;;  %v999_v6 = vld [vmem:[#allocation9 + $0x28] sm:$0xff] }
  0xc7   : > { %849 = vmatpush2.msra.mxu0 %v757_v8  ;;  %v1085_v8 = vld [vmem:[#allocation9 + $0x2d0] sm:$0xff]  ;;  %1127 = vmatprep.subr.mxu1 %v1086_v7  ;;  %v1059_v7 = vld [vmem:[#allocation9 + $0x200] sm:$0xff] }
  0xc8   : > { %850 = vmatprep.subr.mxu0 %v756_v9  ;;  %v1084_v9 = vld [vmem:[#allocation9 + $0x2c8] sm:$0xff]  ;;  %1128 = vmatpush1.msra.mxu1 %v1085_v8  ;;  %v998_v8 = vld [vmem:[#allocation9 + $0x20] sm:$0xff] }
  0xc9   : > { %851 = vmatpush2.msra.mxu0 %v755_v10  ;;  %v1025_v10 = vld [vmem:[#allocation9 + $0xf8] sm:$0xff]  ;;  %1129 = vmatprep.subr.mxu1 %v1084_v9 }
  0xca   : > { %852 = vmatprep.subr.mxu0 %v754_v11  ;;  %v1024_v11 = vld [vmem:[#allocation9 + $0xf0] sm:$0xff]  ;;  %v1122_v9 = vld [vmem:[#allocation9 + $0x3f8] sm:$0xff] }
  0xcb   : > { %853 = vmatpush2.msra.mxu0 %v753_v12  ;;  %v1083_v12 = vld [vmem:[#allocation9 + $0x2c0] sm:$0xff] }
  0xcc   : > { %854 = vmatprep.subr.mxu0 %v752_v13  ;;  %v1023_v13 = vld [vmem:[#allocation9 + $0xe8] sm:$0xff]  ;;  %1130 = vmatpush1.msra.mxu1 %v1083_v12 }
  0xcd   : > { %855 = vmatpush2.msra.mxu0 %v751_v14  ;;  %v1082_v14 = vld [vmem:[#allocation9 + $0x2b8] sm:$0xff]  ;;  %v1120_v12 = vld [vmem:[#allocation9 + $0x3e8] sm:$0xff] }
  0xce   : > { %856 = vmatprep.subr.mxu0 %v750_v16  ;;  %v1021_v16 = vld [vmem:[#allocation9 + $0xd8] sm:$0xff]  ;;  %1131 = vmatprep.subr.mxu1 %v1082_v14 }
  0xcf   : > { %857 = vmatpush2.msra.mxu0 %v749_v20  ;;  %v1020_v20 = vld [vmem:[#allocation9 + $0xd0] sm:$0xff]  ;;  %1132 = vmatpush1.msra.mxu1 %v1081_v19  ;;  %v1118_v14 = vld [vmem:[#allocation9 + $0x3d8] sm:$0xff]  ;;  %v1115_v19 = vld [vmem:[#allocation9 + $0x3c0] sm:$0xff] }
  0xd0   : > { %858 = vmatprep.subr.mxu0 %v748_v21  ;;  %v1080_v21 = vld [vmem:[#allocation9 + $0x2a8] sm:$0xff] }
  0xd1   : > { %859 = vmatpush2.msra.mxu0 %v747_v25  ;;  %v1018_v25 = vld [vmem:[#allocation9 + $0xc0] sm:$0xff]  ;;  %1133 = vmatprep.subr.mxu1 %v1080_v21 }
  0xd2   : > { %860 = vmatprep.subr.mxu0 %v746_v28  ;;  %v1077_v28 = vld [vmem:[#allocation9 + $0x290] sm:$0xff]  ;;  %1134 = vmatpush1.msra.mxu1 %v1079_v24 }
  0xd3   : > { %861 = vmatpush2.msra.mxu0 %v745_v29  ;;  %v1016_v29 = vld [vmem:[#allocation9 + $0xb0] sm:$0xff]  ;;  %1135 = vmatprep.subr.mxu1 %v1078_v26 }
  0xd4   : > { %863 = vmatmul.mubr.f32.vlgmr.msra.gmra.mxu0 %v786_v30  ;;  %1200 = vmatprep.subr.mxu0 %v1025_v10  ;;  %v1076_v30 = vld [vmem:[#allocation9 + $0x288] sm:$0xff]  ;;  %v997_v10 = vld [vmem:[#allocation9 + $0x18] sm:$0xff] }
  0xd5   : > { %868 = vmatprep.mubr.f32.mxu0 %v793_v32  ;;  %1201 = vmatpush1.msra.mxu0 %v1024_v11  ;;  %v1075_v32 = vld [vmem:[#allocation9 + $0x280] sm:$0xff]  ;;  %v1121_v11 = vld [vmem:[#allocation9 + $0x3f0] sm:$0xff] }
  0xd6   : > { %1202 = vmatprep.subr.mxu0 %v1023_v13  ;;  %1136 = vmatpush1.msra.mxu1 %v1077_v28  ;;  %v1119_v13 = vld [vmem:[#allocation9 + $0x3e0] sm:$0xff] }
  0xd7   : > { %1203 = vmatpush1.msra.mxu0 %v1022_v15  ;;  %1137 = vmatprep.subr.mxu1 %v1076_v30  ;;  %v1117_v15 = vld [vmem:[#allocation9 + $0x3d0] sm:$0xff] }
  0xd8   : > { %869 = vmatmul.mubr.f32.gmra.mxu0 %v791_v18  ;;  %1204 = vmatprep.subr.mxu0 %v1021_v16  ;;  %v1014_v18 = vld [vmem:[#allocation9 + $0xa0] sm:$0xff]  ;;  %v1116_v16 = vld [vmem:[#allocation9 + $0x3c8] sm:$0xff] }
  0xd9   : > { %1205 = vmatpush1.msra.mxu0 %v1020_v20  ;;  %1138 = vmatpush1.msra.mxu1 %v1075_v32  ;;  %v996_v32 = vld [vmem:[#allocation9 + $0x10] sm:$0xff] }
  0xda   : > { %1206 = vmatprep.subr.mxu0 %v1019_v23 }
  0xdb   : > { %1207 = vmatpush1.msra.mxu0 %v1018_v25 }
  0xdc   : > { %1208 = vmatprep.subr.mxu0 %v1017_v27 }
  0xdd   : > { %1209 = vmatpush1.msra.mxu0 %v1016_v29 }
  0xde   : > { %1210 = vmatprep.subr.mxu0 %v1015_v31  ;;  %v1114_v31 = vld [vmem:[#allocation9 + $0x3b8] sm:$0xff] }
  0xdf   : > { %1211 = vmatpush1.msra.mxu0 %v1014_v18  ;;  %v1111_v18 = vld [vmem:[#allocation9 + $0x3a0] sm:$0xff] }
  0xe0   : > { %1212 = vmatprep.subr.mxu0 %v1013_v34  ;;  %v1110_v34 = vld [vmem:[#allocation9 + $0x398] sm:$0xff] }
 0x153   : > { %v618_v33 = vpop.f32.mrf.mxu0  ;;  %v695_v35 = vpop.f32.mrf.mxu1 }
 0x154   : > { %v696_v42 = vadd.f32 %v695_v35, %v618_v33  ;;  %v1074_v33 = vld [vmem:[#allocation9 + $0x278] sm:$0xff]  ;;  %v1073_v35 = vld [vmem:[#allocation9 + $0x270] sm:$0xff] }
 0x155   : > { %v620_v36 = vpop.f32.mrf.mxu0  ;;  %v697_v39 = vpop.f32.mrf.mxu1  ;;  %1139 = vmatprep.subr.mxu1 %v1074_v33  ;;  %v1057_v33 = vld [vmem:[#allocation9 + $0x1f8] sm:$0xff] }
 0x156   : > { %v698_v45 = vadd.f32 %v697_v39, %v620_v36  ;;  %v1012_v36 = vld [vmem:[#allocation9 + $0x90] sm:$0xff]  ;;  %v1011_v39 = vld [vmem:[#allocation9 + $0x88] sm:$0xff]  ;;  %1140 = vmatpush1.msra.mxu1 %v1073_v35 }
 0x157   : > { %v701_v40 = vpop.f32.mrf.mxu1  ;;  %1213 = vmatpush1.msra.mxu0 %v1012_v36  ;;  %v1056_v35 = vld [vmem:[#allocation9 + $0x1f0] sm:$0xff] }
 0x158   : > { %v624_v37 = vpop.f32.mrf.mxu0  ;;  %1214 = vmatprep.subr.mxu0 %v1011_v39  ;;  %v1109_v36 = vld [vmem:[#allocation9 + $0x390] sm:$0xff]  ;;  %v1108_v39 = vld [vmem:[#allocation9 + $0x388] sm:$0xff] }
 0x159   : > { %v703_v47 = vpop.f32.mrf.mxu1  ;;  %v702_v49 = vadd.f32 %v701_v40, %v624_v37  ;;  %v1072_v37 = vld [vmem:[#allocation9 + $0x268] sm:$0xff]  ;;  %v1010_v40 = vld [vmem:[#allocation9 + $0x80] sm:$0xff] }
 0x15a   : > { %v626_v41 = vpop.f32.mrf.mxu0  ;;  %1141 = vmatprep.subr.mxu1 %v1072_v37  ;;  %1215 = vmatpush1.msra.mxu0 %v1010_v40  ;;  %v1055_v37 = vld [vmem:[#allocation9 + $0x1e8] sm:$0xff]  ;;  %v1107_v40 = vld [vmem:[#allocation9 + $0x380] sm:$0xff] }
 0x15b   : > { %v704_v53 = vadd.f32 %v703_v47, %v626_v41  ;;  %v1070_v41 = vld [vmem:[#allocation9 + $0x258] sm:$0xff]  ;;  %1142 = vmatpush1.msra.mxu1 %v1071_v17  ;;  %v1006_v47 = vld [vmem:[#allocation9 + $0x60] sm:$0xff] }
 0x15c   : > { %1143 = vmatprep.subr.mxu1 %v1070_v41  ;;  %v1054_v17 = vld [vmem:[#allocation9 + $0x1e0] sm:$0xff]  ;;  %v1053_v41 = vld [vmem:[#allocation9 + $0x1d8] sm:$0xff] }
 0x194   : > { %v864_v44 = vpop.f32.mrf.mxu0 }
 0x195   : > { %v875_v0 = vadd.f32 %v864_v44, %v696_v42  ;;  %v1009_v42 = vld [vmem:[#allocation9 + $0x78] sm:$0xff]  ;;  %v1008_v44 = vld [vmem:[#allocation9 + $0x70] sm:$0xff] }
 0x196   : > { %v866_v48 = vpop.f32.mrf.mxu0  ;;  %1216 = vmatprep.subr.mxu0 %v1009_v42  ;;  %v1106_v42 = vld [vmem:[#allocation9 + $0x378] sm:$0xff] }
 0x197   : > { %v876_v50 = vadd.f32 %v866_v48, %v698_v45  ;;  %v2063_v51 = vadd.f32 %v884_v43, %v875_v0  ;;  %v1068_v45 = vld [vmem:[#allocation9 + $0x248] sm:$0xff]  ;;  %v1066_v48 = vld [vmem:[#allocation9 + $0x238] sm:$0xff]  ;;  %1217 = vmatpush1.msra.mxu0 %v1008_v44  ;;  %v1105_v44 = vld [vmem:[#allocation9 + $0x370] sm:$0xff] }
 0x198   : > { %v870_v52 = vpop.f32.mrf.mxu0  ;;  %v1007_v0 = vld [vmem:[#allocation9 + $0x68] sm:$0xff] }
 0x199   : > { %v877_v54 = vadd.f32 %v870_v52, %v702_v49  ;;  %v2065_v55 = vadd.f32 %v888_v46, %v876_v50  ;;  %v895_v59 = vmax.f32 %v2063_v51, 0.0  ;;  %v1005_v49 = vld [vmem:[#allocation9 + $0x58] sm:$0xff]  ;;  %v1065_v50 = vld [vmem:[#allocation9 + $0x230] sm:$0xff]  ;;  %1218 = vmatprep.subr.mxu0 %v1007_v0  ;;  %v1104_v0 = vld [vmem:[#allocation9 + $0x368] sm:$0xff] }
 0x19a   : > { %v872_v56 = vpop.f32.mrf.mxu0  ;;  %v1004_v52 = vld [vmem:[#allocation9 + $0x50] sm:$0xff]  ;;  %1219 = vmatpush1.msra.mxu0 %v1006_v47  ;;  %v1103_v47 = vld [vmem:[#allocation9 + $0x360] sm:$0xff] }
 0x19b   : > { %v2067_v57 = vadd.f32 %v884_v43, %v877_v54  ;;  %v878_v58 = vadd.f32 %v872_v56, %v704_v53  ;;  %v896_v60 = vmax.f32 %v2065_v55, 0.0  ;;  %v1069_v43 = vld [vmem:[#allocation9 + $0x250] sm:$0xff]  ;;  %v1064_v53 = vld [vmem:[#allocation9 + $0x228] sm:$0xff]  ;;  %v1063_v56 = vld [vmem:[#allocation9 + $0x220] sm:$0xff]  ;;  %1220 = vmatprep.subr.mxu0 %v1005_v49 }
 0x19c   : > { %1144 = vmatpush1.msra.mxu1 %v1069_v43  ;;  %v1003_v54 = vld [vmem:[#allocation9 + $0x48] sm:$0xff]  ;;  %1221 = vmatpush1.msra.mxu0 %v1004_v52  ;;  %v1052_v43 = vld [vmem:[#allocation9 + $0x1d0] sm:$0xff]  ;;  %v1102_v49 = vld [vmem:[#allocation9 + $0x358] sm:$0xff] }
 0x19d   : > { %v2071_v61 = vadd.f32 %v888_v46, %v878_v58  ;;  %v899_v62 = vadd.f32 %v896_v60, %v895_v59  ;;  %v897_v63 = vmax.f32 %v2067_v57, 0.0  ;;  %v1067_v46 = vld [vmem:[#allocation9 + $0x240] sm:$0xff]  ;;  %1145 = vmatprep.subr.mxu1 %v1068_v45  ;;  %1222 = vmatprep.subr.mxu0 %v1003_v54  ;;  %v1113_v57 = vld [vmem:[#allocation9 + $0x3b0] sm:$0xff]  ;;  %v1051_v45 = vld [vmem:[#allocation9 + $0x1c8] sm:$0xff] }
 0x19e   : > { %1146 = vmatpush1.msra.mxu1 %v1067_v46  ;;  %v1002_v58 = vld [vmem:[#allocation9 + $0x40] sm:$0xff]  ;;  %v1101_v52 = vld [vmem:[#allocation9 + $0x350] sm:$0xff]  ;;  %v1100_v54 = vld [vmem:[#allocation9 + $0x348] sm:$0xff] }
 0x19f   : > { %v898_v1 = vmax.f32 %v2071_v61, 0.0  ;;  %900 = vadd.xlane.f32.xlu0 %v899_v62  ;;  %1147 = vmatprep.subr.mxu1 %v1066_v48  ;;  %v1062_v62 = vld [vmem:[#allocation9 + $0x218] sm:$0xff]  ;;  %v1112_v61 = vld [vmem:[#allocation9 + $0x3a8] sm:$0xff]  ;;  %v1050_v46 = vld [vmem:[#allocation9 + $0x1c0] sm:$0xff] }
 0x1a0   : > { %1148 = vmatpush1.msra.mxu1 %v1065_v50  ;;  %1223 = vmatpush1.msra.mxu0 %v1002_v58  ;;  %v1049_v48 = vld [vmem:[#allocation9 + $0x1b8] sm:$0xff]  ;;  %v1048_v50 = vld [vmem:[#allocation9 + $0x1b0] sm:$0xff]  ;;  %v1099_v58 = vld [vmem:[#allocation9 + $0x340] sm:$0xff] }
 0x1a1   : > { %v902_v2 = vadd.f32 %v898_v1, %v897_v63  ;;  %1149 = vmatprep.subr.mxu1 %v1064_v53  ;;  %v1047_v53 = vld [vmem:[#allocation9 + $0x1a8] sm:$0xff] }
 0x1a2   : > { %1150 = vmatpush1.msra.mxu1 %v1063_v56  ;;  %v1046_v56 = vld [vmem:[#allocation9 + $0x1a0] sm:$0xff] }
 0x1a3   : > { %903 = vadd.xlane.f32.xlu0 %v902_v2  ;;  %v1001_v2 = vld [vmem:[#allocation9 + $0x38] sm:$0xff]  ;;  %1151 = vmatprep.subr.mxu1 %v1062_v62 }
 0x1a4   : > { %1224 = vmatprep.subr.mxu0 %v1001_v2  ;;  %1152 = vmatpush1.msra.mxu1 %v1061_v3  ;;  %v1045_v62 = vld [vmem:[#allocation9 + $0x198] sm:$0xff]  ;;  %v1044_v3 = vld [vmem:[#allocation9 + $0x190] sm:$0xff] }
 0x1a5   : > { %1225 = vmatpush1.msra.mxu0 %v1000_v4  ;;  %1153 = vmatprep.subr.mxu1 %v1060_v5  ;;  %v1098_v2 = vld [vmem:[#allocation9 + $0x338] sm:$0xff]  ;;  %v1097_v4 = vld [vmem:[#allocation9 + $0x330] sm:$0xff]  ;;  %v1043_v5 = vld [vmem:[#allocation9 + $0x188] sm:$0xff] }
 0x1a6   : > { %1226 = vmatprep.subr.mxu0 %v999_v6  ;;  %1154 = vmatpush1.msra.mxu1 %v1059_v7  ;;  %v1096_v6 = vld [vmem:[#allocation9 + $0x328] sm:$0xff]  ;;  %v1042_v7 = vld [vmem:[#allocation9 + $0x180] sm:$0xff] }
 0x1a7   : > { %1227 = vmatpush1.msra.mxu0 %v998_v8  ;;  %1155 = vmatprep.subr.mxu1 %v1122_v9  ;;  %v1095_v8 = vld [vmem:[#allocation9 + $0x320] sm:$0xff]  ;;  %v1041_v9 = vld [vmem:[#allocation9 + $0x178] sm:$0xff] }
 0x1a8   : > { %1228 = vmatprep.subr.mxu0 %v997_v10  ;;  %1156 = vmatpush2.msra.mxu1 %v1121_v11  ;;  %v1094_v10 = vld [vmem:[#allocation9 + $0x318] sm:$0xff]  ;;  %v1040_v11 = vld [vmem:[#allocation9 + $0x170] sm:$0xff] }
 0x1a9   : > { %1157 = vmatprep.subr.mxu1 %v1120_v12  ;;  %1229 = vmatpush1.msra.mxu0 %v996_v32  ;;  %v1093_v12 = vld [vmem:[#allocation9 + $0x310] sm:$0xff]  ;;  %v1026_v32 = vld [vmem:[#allocation9 + $0x100] sm:$0xff] }
 0x1aa   : > { %1158 = vmatpush2.msra.mxu1 %v1119_v13  ;;  %v1039_v13 = vld [vmem:[#allocation9 + $0x168] sm:$0xff] }
 0x1ab   : > { %1159 = vmatprep.subr.mxu1 %v1118_v14  ;;  %v1092_v14 = vld [vmem:[#allocation9 + $0x308] sm:$0xff] }
 0x1ac   : > { %1160 = vmatpush2.msra.mxu1 %v1117_v15  ;;  %v1038_v15 = vld [vmem:[#allocation9 + $0x160] sm:$0xff] }
 0x1ad   : > { %1161 = vmatprep.subr.mxu1 %v1116_v16  ;;  %v1091_v16 = vld [vmem:[#allocation9 + $0x300] sm:$0xff] }
 0x1ae   : > { %1162 = vmatpush2.msra.mxu1 %v1115_v19  ;;  %v1037_v19 = vld [vmem:[#allocation9 + $0x158] sm:$0xff] }
 0x1af   : > { %1163 = vmatprep.subr.mxu1 %v1114_v31  ;;  %v1027_v31 = vld [vmem:[#allocation9 + $0x108] sm:$0xff] }
 0x1b0   : > { %1164 = vmatpush2.msra.mxu1 %v1113_v57 }
 0x1b1   : > { %1165 = vmatprep.subr.mxu1 %v1112_v61 }
 0x1b2   : > { %1166 = vmatpush2.msra.mxu1 %v1111_v18 }
 0x1b3   : > { %1167 = vmatprep.subr.mxu1 %v1110_v34  ;;  %v931_v34 = vld [vmem:[%s2170_s3] sm:$0x3] }
 0x1b4   : > { %1168 = vmatpush2.msra.mxu1 %v1109_v36  ;;  %v936_v36 = vrot.slane %v931_v34, %v2054_v38 }
 0x1b5   : > { %1169 = vmatprep.subr.mxu1 %v1108_v39 }
 0x1b6   : > { %1170 = vmatpush2.msra.mxu1 %v1107_v40 }
 0x1b7   : > { %1171 = vmatprep.subr.mxu1 %v1106_v42 }
 0x1b8   : > { %1172 = vmatpush2.msra.mxu1 %v1105_v44 }
 0x1b9   : > { %1173 = vmatprep.subr.mxu1 %v1104_v0 }
 0x1ba   : > { %1174 = vmatpush2.msra.mxu1 %v1103_v47 }
 0x1bb   : > { %1175 = vmatprep.subr.mxu1 %v1102_v49  ;;  %v1314_v49 = vld [vmem:[#allocation9 + $0x4f0] sm:$0xff] }
 0x1bc   : > { %1176 = vmatpush2.msra.mxu1 %v1101_v52 }
 0x1bd   : > { %1177 = vmatprep.subr.mxu1 %v1100_v54  ;;  %v1312_v54 = vld [vmem:[#allocation9 + $0x4e0] sm:$0xff] }
 0x1be   : > { %1178 = vmatpush2.msra.mxu1 %v1099_v58  ;;  %v1311_v58 = vld [vmem:[#allocation9 + $0x4d8] sm:$0xff] }
 0x1bf   : > { %1179 = vmatprep.subr.mxu1 %v1098_v2  ;;  %v1310_v2 = vld [vmem:[#allocation9 + $0x4d0] sm:$0xff] }
 0x1c0   : > { %1180 = vmatpush2.msra.mxu1 %v1097_v4  ;;  %v1308_v4 = vld [vmem:[#allocation9 + $0x4c0] sm:$0xff] }
 0x1c1   : > { %1181 = vmatprep.subr.mxu1 %v1096_v6 }
 0x1c2   : > { %1182 = vmatpush2.msra.mxu1 %v1095_v8  ;;  %v1306_v8 = vld [vmem:[#allocation9 + $0x4b0] sm:$0xff] }
 0x1c3   : > { %1183 = vmatprep.subr.mxu1 %v1094_v10  ;;  %v1304_v10 = vld [vmem:[#allocation9 + $0x4a0] sm:$0xff] }
 0x1c4   : > { %1184 = vmatpush2.msra.mxu1 %v1093_v12 }
 0x1c5   : > { %1185 = vmatprep.subr.mxu1 %v1092_v14  ;;  %v1303_v14 = vld [vmem:[#allocation9 + $0x498] sm:$0xff] }
 0x1c6   : > { %1186 = vmatpush2.msra.mxu1 %v1091_v16 }
 0x228   : > { %v901_v20 = vpop.xlane.xlu0 %900 }
 0x229   : > { %v905_v21 = vmul.f32 0.00390625, %v901_v20  ;;  %v1036_v20 = vld [vmem:[#allocation9 + $0x150] sm:$0xff] }
 0x22b   : > { %v2085_v23 = vsub.f32 %v895_v59, %v905_v21  ;;  %v2089_v24 = vsub.f32 %v896_v60, %v905_v21  ;;  %v1315_v21 = vld [vmem:[#allocation9 + $0x4f8] sm:$0xff] }
 0x22c   : > { %v904_v25 = vpop.xlane.xlu0 %903  ;;  %1368 = vmatprep.subr.mxu1 %v1315_v21 }
 0x22d   : > { %v906_v26 = vmul.f32 0.00390625, %v904_v25  ;;  %v911_v27 = vmul.f32 %v2085_v23, %v2085_v23  ;;  %v912_v28 = vmul.f32 %v2089_v24, %v2089_v24  ;;  %v1035_v25 = vld [vmem:[#allocation9 + $0x148] sm:$0xff] }
 0x22f   : > { %v2097_v29 = vsub.f32 %v897_v63, %v906_v26  ;;  %v2101_v51 = vsub.f32 %v898_v1, %v906_v26  ;;  %v915_v59 = vadd.f32 %v912_v28, %v911_v27  ;;  %v995_v63 = vld [vmem:[#allocation9 + $0x8] sm:$0xff]  ;;  %v994_v1 = vld [vmem:[#allocation9] sm:$0xff]  ;;  %v1033_v27 = vld [vmem:[#allocation9 + $0x138] sm:$0xff] }
 0x230   : > { %1230 = vmatprep.subr.mxu0 %v995_v63  ;;  %v1034_v26 = vld [vmem:[#allocation9 + $0x140] sm:$0xff]  ;;  %v1032_v28 = vld [vmem:[#allocation9 + $0x130] sm:$0xff] }
 0x231   : > { %916 = vadd.xlane.f32.xlu1 %v915_v59  ;;  %v913_v55 = vmul.f32 %v2097_v29, %v2097_v29  ;;  %v914_v60 = vmul.f32 %v2101_v51, %v2101_v51  ;;  %1231 = vmatpush1.msra.mxu0 %v994_v1  ;;  %v1031_v59 = vld [vmem:[#allocation9 + $0x128] sm:$0xff] }
 0x232   : > { %1232 = vmatprep.subr.mxu0 %v1057_v33 }
 0x233   : > { %v918_v30 = vadd.f32 %v914_v60, %v913_v55  ;;  %1233 = vmatpush2.msra.mxu0 %v1056_v35  ;;  %v1030_v55 = vld [vmem:[#allocation9 + $0x120] sm:$0xff]  ;;  %v1029_v60 = vld [vmem:[#allocation9 + $0x118] sm:$0xff] }
 0x234   : > { %1234 = vmatprep.subr.mxu0 %v1055_v37  ;;  %v947_v35 = vld [vmem:[%s2171_s4] sm:$0x3]  ;;  %v940_v37 = vrot.slane %v931_v34, %v2059_v22 }
 0x235   : > { %919 = vadd.xlane.f32.xlu1 %v918_v30  ;;  %1235 = vmatpush2.msra.mxu0 %v1054_v17  ;;  %v1028_v30 = vld [vmem:[#allocation9 + $0x110] sm:$0xff]  ;;  %v956_v42 = vrot.slane %v947_v35, %v2059_v22  ;;  %v1284_v34 = vld [vmem:[#allocation9 + $0x400] sm:$0xff] }
 0x236   : > { %1236 = vmatprep.subr.mxu0 %v1053_v41  ;;  %v952_v41 = vrot.slane %v947_v35, %v2054_v38  ;;  %v1347_v35 = vld [vmem:[#allocation9 + $0x5f8] sm:$0xff] }
 0x237   : > { %1237 = vmatpush2.msra.mxu0 %v1052_v43 }
 0x238   : > { %1238 = vmatprep.subr.mxu0 %v1051_v45 }
 0x239   : > { %1239 = vmatpush2.msra.mxu0 %v1050_v46 }
 0x23a   : > { %1240 = vmatprep.subr.mxu0 %v1049_v48 }
 0x23b   : > { %1241 = vmatpush2.msra.mxu0 %v1048_v50 }
 0x23c   : > { %1242 = vmatprep.subr.mxu0 %v1047_v53 }
 0x23d   : > { %1243 = vmatpush2.msra.mxu0 %v1046_v56 }
 0x23e   : > { %1244 = vmatprep.subr.mxu0 %v1045_v62 }
 0x23f   : > { %1245 = vmatpush2.msra.mxu0 %v1044_v3  ;;  %v1309_v3 = vld [vmem:[#allocation9 + $0x4c8] sm:$0xff] }
 0x240   : > { %1246 = vmatprep.subr.mxu0 %v1043_v5 }
 0x241   : > { %1247 = vmatpush2.msra.mxu0 %v1042_v7  ;;  %v1307_v7 = vld [vmem:[#allocation9 + $0x4b8] sm:$0xff] }
 0x242   : > { %1248 = vmatprep.subr.mxu0 %v1041_v9  ;;  %v1305_v9 = vld [vmem:[#allocation9 + $0x4a8] sm:$0xff] }
 0x243   : > { %1249 = vmatpush2.msra.mxu0 %v1040_v11 }
 0x244   : > { %1250 = vmatprep.subr.mxu0 %v1039_v13 }
 0x245   : > { %1251 = vmatpush2.msra.mxu0 %v1038_v15 }
 0x246   : > { %1252 = vmatprep.subr.mxu0 %v1037_v19  ;;  %v1302_v19 = vld [vmem:[#allocation9 + $0x490] sm:$0xff] }
 0x247   : > { %1253 = vmatpush2.msra.mxu0 %v1036_v20  ;;  %v1301_v20 = vld [vmem:[#allocation9 + $0x488] sm:$0xff] }
 0x248   : > { %1254 = vmatprep.subr.mxu0 %v1035_v25  ;;  %v1300_v25 = vld [vmem:[#allocation9 + $0x480] sm:$0xff] }
 0x249   : > { %1255 = vmatpush2.msra.mxu0 %v1034_v26  ;;  %v1299_v26 = vld [vmem:[#allocation9 + $0x478] sm:$0xff] }
 0x24a   : > { %1256 = vmatprep.subr.mxu0 %v1033_v27  ;;  %v1298_v27 = vld [vmem:[#allocation9 + $0x470] sm:$0xff] }
 0x24b   : > { %1257 = vmatpush2.msra.mxu0 %v1032_v28  ;;  %v1297_v28 = vld [vmem:[#allocation9 + $0x468] sm:$0xff] }
 0x24c   : > { %1258 = vmatprep.subr.mxu0 %v1031_v59  ;;  %v1296_v59 = vld [vmem:[#allocation9 + $0x460] sm:$0xff] }
 0x24d   : > { %1259 = vmatpush2.msra.mxu0 %v1030_v55  ;;  %v1295_v55 = vld [vmem:[#allocation9 + $0x458] sm:$0xff] }
 0x24e   : > { %1260 = vmatprep.subr.mxu0 %v1029_v60  ;;  %v1294_v60 = vld [vmem:[#allocation9 + $0x450] sm:$0xff] }
 0x24f   : > { %1261 = vmatpush2.msra.mxu0 %v1028_v30  ;;  %v1293_v30 = vld [vmem:[#allocation9 + $0x448] sm:$0xff] }
 0x250   : > { %1262 = vmatprep.subr.mxu0 %v1027_v31  ;;  %v1292_v31 = vld [vmem:[#allocation9 + $0x440] sm:$0xff] }
 0x251   : > { %1263 = vmatpush2.msra.mxu0 %v1026_v32  ;;  %v1291_v32 = vld [vmem:[#allocation9 + $0x438] sm:$0xff] }
 0x2ba   : > { %v917_v57 = vpop.xlane.xlu1 %916 }
 0x2bb   : > { %v921_v63 = vmul.f32 0.00390625, %v917_v57  ;;  %v1290_v57 = vld [vmem:[#allocation9 + $0x430] sm:$0xff] }
 0x2bd   : > { %v923_v61 = vadd.f32 1e-05, %v921_v63  ;;  %v1289_v63 = vld [vmem:[#allocation9 + $0x428] sm:$0xff] }
 0x2be   : > { %v920_v1 = vpop.xlane.xlu1 %919 }
 0x2bf   : > { %1697 = vrsqrt.f32 %v923_v61  ;;  %v922_v18 = vmul.f32 0.00390625, %v920_v1  ;;  %v1288_v61 = vld [vmem:[#allocation9 + $0x420] sm:$0xff]  ;;  %v1287_v1 = vld [vmem:[#allocation9 + $0x418] sm:$0xff] }
 0x2c1   : > { %v924_v33 = vadd.f32 1e-05, %v922_v18  ;;  %v1286_v18 = vld [vmem:[#allocation9 + $0x410] sm:$0xff] }
 0x2c3   : > { %1699 = vrsqrt.f32 %v924_v33  ;;  %v1285_v33 = vld [vmem:[#allocation9 + $0x408] sm:$0xff] }
 0x2cc   : > { %v1698_v39 = vpop.eup %1697 }
 0x2cd   : > { %v927_v17 = vmul.f32 %v1698_v39, %v2085_v23  ;;  %v928_v40 = vmul.f32 %v1698_v39, %v2089_v24  ;;  %v1313_v23 = vld [vmem:[#allocation9 + $0x4e8] sm:$0xff]  ;;  %v1344_v39 = vld [vmem:[#allocation9 + $0x5e0] sm:$0xff] }
 0x2cf   : > { %v943_v43 = vmul.f32 %v936_v36, %v927_v17  ;;  %v944_v44 = vmul.f32 %v940_v37, %v928_v40  ;;  %v1343_v17 = vld [vmem:[#allocation9 + $0x5d8] sm:$0xff]  ;;  %v1342_v40 = vld [vmem:[#allocation9 + $0x5d0] sm:$0xff] }
 0x2d0   : > { %v1700_v45 = vpop.eup %1699 }
 0x2d1   : > { %v959_v0 = vadd.f32 %v952_v41, %v943_v43  ;;  %v960_v46 = vadd.f32 %v956_v42, %v944_v44  ;;  %v930_v47 = vmul.f32 %v1700_v45, %v2101_v51  ;;  %v929_v48 = vmul.f32 %v1700_v45, %v2097_v29  ;;  %v1339_v43 = vld [vmem:[#allocation9 + $0x5b8] sm:$0xff]  ;;  %v1338_v44 = vld [vmem:[#allocation9 + $0x5b0] sm:$0xff]  ;;  %v1337_v45 = vld [vmem:[#allocation9 + $0x5a8] sm:$0xff] }
 0x2d3   : > { %v972_v50 = vrot.slane %v959_v0, 7  ;;  %v973_v52 = vrot.slane %v960_v46, 7  ;;  %1187 = vmatprep.mubr.f32.mxu1 %v960_v46  ;;  %v946_v53 = vmul.f32 %v940_v37, %v930_v47  ;;  %v945_v24 = vmul.f32 %v936_v36, %v929_v48  ;;  %v1346_v36 = vld [vmem:[#allocation9 + $0x5f0] sm:$0xff]  ;;  %v1345_v37 = vld [vmem:[#allocation9 + $0x5e8] sm:$0xff]  ;;  %v1335_v46 = vld [vmem:[#allocation9 + $0x598] sm:$0xff] }
 0x2d4   : > { %1188 = vmatmul.mubr.f32.vlgmr.msra.gmra.mxu1 %v959_v0  ;;  %v1336_v0 = vld [vmem:[#allocation9 + $0x5a0] sm:$0xff]  ;;  %v1334_v47 = vld [vmem:[#allocation9 + $0x590] sm:$0xff]  ;;  %v1333_v48 = vld [vmem:[#allocation9 + $0x588] sm:$0xff] }
 0x2d5   : > { %984 = vst [vmem:[#allocation3] sm:$0xfe] %v972_v50  ;;  %985 = vst [vmem:[#allocation3 + $0x8] sm:$0xfe] %v973_v52  ;;  %1369 = vmatpush1.msra.mxu1 %v1314_v49  ;;  %v962_v56 = vadd.f32 %v956_v42, %v946_v53  ;;  %v961_v62 = vadd.f32 %v952_v41, %v945_v24  ;;  %v1341_v41 = vld [vmem:[#allocation9 + $0x5c8] sm:$0xff]  ;;  %v1340_v42 = vld [vmem:[#allocation9 + $0x5c0] sm:$0xff] }
 0x2d6   : > { %1370 = vmatprep.subr.mxu1 %v1313_v23  ;;  %v1332_v49 = vld [vmem:[#allocation9 + $0x580] sm:$0xff]  ;;  %v1329_v23 = vld [vmem:[#allocation9 + $0x568] sm:$0xff]  ;;  %v1327_v24 = vld [vmem:[#allocation9 + $0x558] sm:$0xff] }
 0x2d7   : > { %1371 = vmatpush1.msra.mxu1 %v1312_v54  ;;  %v976_v51 = vrot.slane %v962_v56, 7  ;;  %1193 = vmatprep.mubr.f32.mxu1 %v962_v56  ;;  %v974_v29 = vrot.slane %v961_v62, 7  ;;  %v1328_v53 = vld [vmem:[#allocation9 + $0x560] sm:$0xff]  ;;  %v1326_v54 = vld [vmem:[#allocation9 + $0x550] sm:$0xff]  ;;  %v1325_v56 = vld [vmem:[#allocation9 + $0x548] sm:$0xff] }
 0x2d8   : > { %1372 = vmatprep.subr.mxu1 %v1311_v58  ;;  %1194 = vmatmul.mubr.f32.gmra.mxu1 %v961_v62  ;;  %v1324_v58 = vld [vmem:[#allocation9 + $0x540] sm:$0xff]  ;;  %v1323_v62 = vld [vmem:[#allocation9 + $0x538] sm:$0xff] }
 0x2d9   : > { %v2122_v5 = vsel %vm400_vm1, %v973_v52, %v976_v51  ;;  %989 = vst [vmem:[#allocation3 + $0x28] sm:$0x1] %v976_v51  ;;  %v2125_v6 = vsel %vm400_vm1, %v972_v50, %v974_v29  ;;  %988 = vst [vmem:[#allocation3 + $0x20] sm:$0x1] %v974_v29  ;;  %1373 = vmatpush1.msra.mxu1 %v1310_v2  ;;  %v1331_v50 = vld [vmem:[#allocation9 + $0x578] sm:$0xff]  ;;  %v1330_v52 = vld [vmem:[#allocation9 + $0x570] sm:$0xff] }
 0x2da   : > { %1374 = vmatprep.subr.mxu1 %v1309_v3  ;;  %v1358_v16 = vrot.slane %v2122_v5, 2  ;;  %v1322_v2 = vld [vmem:[#allocation9 + $0x530] sm:$0xff]  ;;  %v1321_v51 = vld [vmem:[#allocation9 + $0x528] sm:$0xff]  ;;  %v1320_v29 = vld [vmem:[#allocation9 + $0x520] sm:$0xff] }
 0x2db   : > { %1375 = vmatpush1.msra.mxu1 %v1308_v4  ;;  %v1319_v4 = vld [vmem:[#allocation9 + $0x518] sm:$0xff] }
 0x2dc   : > { %1376 = vmatprep.subr.mxu1 %v1307_v7  ;;  %v991_v11 = vld [vmem:[#allocation3 + $0x8] sm:$0xff]  ;;  %v990_v12 = vld [vmem:[#allocation3] sm:$0xff] }
 0x2dd   : > { %v1278_v13 = vld [vmem:[#allocation3 + $0x8] sm:$0xfc]  ;;  %1377 = vmatpush1.msra.mxu1 %v1306_v8  ;;  %1264 = vmatprep.mubr.f32.mxu0 %v991_v11  ;;  %v1277_v3 = vld [vmem:[#allocation3] sm:$0xfc]  ;;  %v1316_v11 = vld [vmem:[#allocation9 + $0x500] sm:$0xff] }
 0x2de   : > { %v1357_v15 = vrot.slane %v1278_v13, 2  ;;  %1378 = vmatprep.subr.mxu1 %v1305_v9  ;;  %1265 = vmatmul.mubr.f32.vlgmr.msra.gmra.mxu0 %v990_v12  ;;  %v1318_v8 = vld [vmem:[#allocation9 + $0x510] sm:$0xff]  ;;  %v1317_v9 = vld [vmem:[#allocation9 + $0x508] sm:$0xff] }
 0x2df   : > { %1379 = vmatpush1.msra.mxu1 %v1304_v10  ;;  %1270 = vmatprep.mubr.f32.mxu0 %v2122_v5  ;;  %v1354_v10 = vrot.slane %v1277_v3, 2 }
 0x2e0   : > { %v1359_v21 = vsel %vm783_vm2, %v1357_v15, %v1358_v16  ;;  %1380 = vmatprep.subr.mxu1 %v1303_v14  ;;  %v1282_v7 = vld [vmem:[#allocation3 + $0x28] sm:$0x3]  ;;  %v1281_v13 = vld [vmem:[#allocation3 + $0x20] sm:$0x3]  ;;  %v1355_v14 = vrot.slane %v2125_v6, 2 }
 0x2e1   : > { %1432 = vmatprep.mubr.f32.mxu1 %v1359_v21  ;;  %1381 = vmatpush1.msra.mxu1 %v1302_v19  ;;  %v1362_v12 = vrot.slane %v1282_v7, 2  ;;  %v1360_v19 = vrot.slane %v1281_v13, 2 }
 0x2e2   : > { %1382 = vmatprep.subr.mxu1 %v1301_v20  ;;  %1271 = vmatmul.mubr.f32.gmra.mxu0 %v2125_v6  ;;  %v1356_v15 = vsel %vm783_vm2, %v1354_v10, %v1355_v14  ;;  %v1449_v6 = vld [vmem:[%s2173_s6] sm:$0x3] }
 0x2e3   : > { %1383 = vmatpush1.msra.mxu1 %v1300_v25  ;;  %v1363_v20 = vsel %vm783_vm2, %v1358_v16, %v1362_v12  ;;  %v1361_v21 = vsel %vm783_vm2, %v1355_v14, %v1360_v19  ;;  %v1454_v5 = vrot.slane %v1449_v6, %v2054_v38  ;;  %v1501_v10 = vld [vmem:[%s2174_s7] sm:$0x3] }
 0x2e4   : > { %1384 = vmatprep.subr.mxu1 %v1299_v26  ;;  %v1510_v12 = vrot.slane %v1501_v10, %v2059_v22 }
 0x2e5   : > { %1385 = vmatpush1.msra.mxu1 %v1298_v27 }
 0x2e6   : > { %1386 = vmatprep.subr.mxu1 %v1297_v28 }
 0x2e7   : > { %1387 = vmatpush1.msra.mxu1 %v1296_v59 }
 0x2e8   : > { %1388 = vmatprep.subr.mxu1 %v1295_v55 }
 0x2e9   : > { %1389 = vmatpush1.msra.mxu1 %v1294_v60 }
 0x2ea   : > { %1390 = vmatprep.subr.mxu1 %v1293_v30 }
 0x2eb   : > { %1391 = vmatpush1.msra.mxu1 %v1292_v31 }
 0x2ec   : > { %1392 = vmatprep.subr.mxu1 %v1291_v32 }
 0x2ed   : > { %1393 = vmatpush1.msra.mxu1 %v1290_v57  ;;  %v1458_v57 = vrot.slane %v1449_v6, %v2059_v22 }
 0x2ee   : > { %1394 = vmatprep.subr.mxu1 %v1289_v63 }
 0x2ef   : > { %1395 = vmatpush1.msra.mxu1 %v1288_v61 }
 0x2f0   : > { %1396 = vmatprep.subr.mxu1 %v1287_v1 }
 0x2f1   : > { %1397 = vmatpush1.msra.mxu1 %v1286_v18 }
 0x2f2   : > { %1398 = vmatprep.subr.mxu1 %v1285_v33 }
 0x2f3   : > { %1399 = vmatpush1.msra.mxu1 %v1284_v34 }
 0x2f4   : > { %1400 = vmatprep.subr.mxu1 %v1347_v35 }
 0x2f5   : > { %1401 = vmatpush2.msra.mxu1 %v1346_v36 }
 0x2f6   : > { %1402 = vmatprep.subr.mxu1 %v1345_v37 }
 0x2f7   : > { %1403 = vmatpush2.msra.mxu1 %v1344_v39 }
 0x2f8   : > { %1404 = vmatprep.subr.mxu1 %v1343_v17 }
 0x2f9   : > { %1405 = vmatpush2.msra.mxu1 %v1342_v40 }
 0x2fa   : > { %1406 = vmatprep.subr.mxu1 %v1341_v41 }
 0x2fb   : > { %1407 = vmatpush2.msra.mxu1 %v1340_v42 }
 0x2fc   : > { %1408 = vmatprep.subr.mxu1 %v1339_v43 }
 0x2fd   : > { %1409 = vmatpush2.msra.mxu1 %v1338_v44 }
 0x2fe   : > { %1410 = vmatprep.subr.mxu1 %v1337_v45 }
 0x2ff   : > { %1411 = vmatpush2.msra.mxu1 %v1336_v0 }
 0x300   : > { %1412 = vmatprep.subr.mxu1 %v1335_v46 }
 0x301   : > { %1413 = vmatpush2.msra.mxu1 %v1334_v47 }
 0x302   : > { %1414 = vmatprep.subr.mxu1 %v1333_v48 }
 0x303   : > { %1415 = vmatpush2.msra.mxu1 %v1332_v49 }
 0x304   : > { %1416 = vmatprep.subr.mxu1 %v1331_v50 }
 0x305   : > { %1417 = vmatpush2.msra.mxu1 %v1330_v52 }
 0x306   : > { %1418 = vmatprep.subr.mxu1 %v1329_v23 }
 0x307   : > { %1419 = vmatpush2.msra.mxu1 %v1328_v53 }
 0x308   : > { %1420 = vmatprep.subr.mxu1 %v1327_v24 }
 0x309   : > { %1421 = vmatpush2.msra.mxu1 %v1326_v54 }
 0x30a   : > { %1422 = vmatprep.subr.mxu1 %v1325_v56 }
 0x30b   : > { %1423 = vmatpush2.msra.mxu1 %v1324_v58 }
 0x30c   : > { %1424 = vmatprep.subr.mxu1 %v1323_v62 }
 0x30d   : > { %1425 = vmatpush2.msra.mxu1 %v1322_v2 }
 0x30e   : > { %1426 = vmatprep.subr.mxu1 %v1321_v51 }
 0x30f   : > { %1427 = vmatpush2.msra.mxu1 %v1320_v29 }
 0x310   : > { %1428 = vmatprep.subr.mxu1 %v1319_v4 }
 0x311   : > { %1429 = vmatpush2.msra.mxu1 %v1318_v8 }
 0x312   : > { %1430 = vmatprep.subr.mxu1 %v1317_v9 }
 0x313   : > { %1431 = vmatpush2.msra.mxu1 %v1316_v11  ;;  %v1506_v11 = vrot.slane %v1501_v10, %v2054_v38  ;;  %v1524_v38 = vstv %s1523_s25 }
 0x314   : > { %1433 = vmatmul.mubr.f32.vlgmr.msra.gmra.mxu1 %v1356_v15 }
 0x315   : > { %1438 = vmatprep.mubr.f32.mxu1 %v1363_v20 }
 0x318   : > { %1439 = vmatmul.mubr.f32.gmra.mxu1 %v1361_v21 }
 0x394   : > { %v1189_v25 = vpop.f32.mrf.mxu1 }
 0x396   : > { %v1191_v26 = vpop.f32.mrf.mxu1 }
 0x398   : > { %v1195_v28 = vpop.f32.mrf.mxu1 }
 0x39a   : > { %v1197_v55 = vpop.f32.mrf.mxu1 }
 0x39e   : > { %v1266_v27 = vpop.f32.mrf.mxu0 }
 0x39f   : > { %v1267_v30 = vadd.f32 %v1266_v27, %v1189_v25 }
 0x3a0   : > { %v1268_v59 = vpop.f32.mrf.mxu0 }
 0x3a1   : > { %v1269_v16 = vadd.f32 %v1268_v59, %v1191_v26 }
 0x3a2   : > { %v1272_v60 = vpop.f32.mrf.mxu0 }
 0x3a3   : > { %v1273_v1 = vadd.f32 %v1272_v60, %v1195_v28 }
 0x3a4   : > { %v1274_v63 = vpop.f32.mrf.mxu0 }
 0x3a5   : > { %v1275_v35 = vadd.f32 %v1274_v63, %v1197_v55 }
 0x3d4   : > { %v1434_v31 = vpop.f32.mrf.mxu1 }
 0x3d5   : > { %v1445_v32 = vadd.f32 %v1434_v31, %v1267_v30 }
 0x3d6   : > { %v1436_v61 = vpop.f32.mrf.mxu1 }
 0x3d7   : > { %v1461_v18 = vadd.f32 %v1454_v5, %v1445_v32  ;;  %v1446_v33 = vadd.f32 %v1436_v61, %v1269_v16 }
 0x3d8   : > { %v1440_v34 = vpop.f32.mrf.mxu1 }
 0x3d9   : > { %v1462_v36 = vadd.f32 %v1458_v57, %v1446_v33  ;;  %v1447_v37 = vadd.f32 %v1440_v34, %v1273_v1  ;;  %v1465_v17 = vmax.f32 %v1461_v18, 0.0 }
 0x3da   : > { %v1442_v39 = vpop.f32.mrf.mxu1 }
 0x3db   : > { %v1466_v40 = vmax.f32 %v1462_v36, 0.0  ;;  %v1463_v41 = vadd.f32 %v1454_v5, %v1447_v37  ;;  %v1448_v42 = vadd.f32 %v1442_v39, %v1275_v35 }
 0x3dd   : > { %v1464_v43 = vadd.f32 %v1458_v57, %v1448_v42  ;;  %v1469_v44 = vadd.f32 %v1466_v40, %v1465_v17  ;;  %v1467_v45 = vmax.f32 %v1463_v41, 0.0 }
 0x3df   : > { %v1468_v0 = vmax.f32 %v1464_v43, 0.0  ;;  %1470 = vadd.xlane.f32.xlu0 %v1469_v44 }
 0x3e1   : > { %v1472_v46 = vadd.f32 %v1468_v0, %v1467_v45 }
 0x3e3   : > { %1473 = vadd.xlane.f32.xlu1 %v1472_v46 }
 0x468   : > { %v1471_v47 = vpop.xlane.xlu0 %1470 }
 0x469   : > { %v1475_v48 = vmul.f32 0.00390625, %v1471_v47 }
 0x46b   : > { %v1477_v49 = vsub.f32 %v1465_v17, %v1475_v48  ;;  %v1478_v50 = vsub.f32 %v1466_v40, %v1475_v48 }
 0x46c   : > { %v1474_v52 = vpop.xlane.xlu1 %1473 }
 0x46d   : > { %v1476_v23 = vmul.f32 0.00390625, %v1474_v52  ;;  %v1481_v53 = vmul.f32 %v1477_v49, %v1477_v49  ;;  %v1482_v24 = vmul.f32 %v1478_v50, %v1478_v50 }
 0x46f   : > { %v1479_v54 = vsub.f32 %v1467_v45, %v1476_v23  ;;  %v1480_v56 = vsub.f32 %v1468_v0, %v1476_v23  ;;  %v1485_v58 = vadd.f32 %v1482_v24, %v1481_v53 }
 0x471   : > { %1486 = vadd.xlane.f32.xlu0 %v1485_v58  ;;  %v1483_v62 = vmul.f32 %v1479_v54, %v1479_v54  ;;  %v1484_v2 = vmul.f32 %v1480_v56, %v1480_v56 }
 0x473   : > { %v1488_v51 = vadd.f32 %v1484_v2, %v1483_v62 }
 0x475   : > { %1489 = vadd.xlane.f32.xlu1 %v1488_v51 }
 0x4fa   : > { %v1487_v29 = vpop.xlane.xlu0 %1486 }
 0x4fb   : > { %v1491_v3 = vmul.f32 0.00390625, %v1487_v29 }
 0x4fd   : > { %v1493_v4 = vadd.f32 1e-05, %v1491_v3 }
 0x4fe   : > { %v1490_v7 = vpop.xlane.xlu1 %1489 }
 0x4ff   : > { %1701 = vrsqrt.f32 %v1493_v4  ;;  %v1492_v8 = vmul.f32 0.00390625, %v1490_v7 }
 0x501   : > { %v1494_v9 = vadd.f32 1e-05, %v1492_v8 }
 0x503   : > { %1703 = vrsqrt.f32 %v1494_v9 }
 0x50c   : > { %v1702_v13 = vpop.eup %1701 }
 0x50d   : > { %v1497_v14 = vmul.f32 %v1702_v13, %v1477_v49  ;;  %v1498_v15 = vmul.f32 %v1702_v13, %v1478_v50 }
 0x50f   : > { %v1513_v19 = vmul.f32 %v1506_v11, %v1497_v14  ;;  %v1514_v20 = vmul.f32 %v1510_v12, %v1498_v15 }
 0x510   : > { %v1704_v21 = vpop.eup %1703 }
 0x511   : > { %v1517_v25 = vadd.f32 %v1514_v20, %v1513_v19  ;;  %v1499_v26 = vmul.f32 %v1704_v21, %v1479_v54  ;;  %v1500_v27 = vmul.f32 %v1704_v21, %v1480_v56 }
 0x513   : > { %1518 = vadd.xlane.f32.xlu0 %v1517_v25  ;;  %v1515_v28 = vmul.f32 %v1506_v11, %v1499_v26  ;;  %v1516_v59 = vmul.f32 %v1510_v12, %v1500_v27 }
 0x515   : > { %v1520_v6 = vadd.f32 %v1516_v59, %v1515_v28 }
 0x517   : > { %1521 = vadd.xlane.f32.xlu1 %v1520_v6 }
 0x59c   : > { %v1519_v22 = vpop.xlane.xlu0 %1518 }
 0x59d   : > { %v1525_v55 = vadd.f32 %v1524_v38, %v1519_v22 }
 0x59f   : > { %1528 = vst.msk [vmem:[%s382_s11] sm:$0xff] %vm1527_vm3, %v1525_v55 }
 0x5a0   : > { %v1522_v60 = vpop.xlane.xlu1 %1521 }
 0x5a1   : > { %v1526_v30 = vadd.f32 %v1524_v38, %v1522_v60 }
 0x5a3   : > { %1529 = vst.msk [vmem:[%s382_s11 + $0x8] sm:$0xff] %vm1527_vm3, %v1526_v30 }
 0x5a4 PF: > { %p21_p12 = scmp.ge.s32.totalorder %s1952_s30, 4   ;;  %s2188_s11 = smov %s1815_s12 }
 0x5a5   : > { %s2189_s12 = smov %s1819_s13  ;;  %s2190_s13 = smov %s1963_s18 }
 0x5a6   : > { %s2191_s14 = smov %s1952_s30  ;;  %23 = sbr.rel (!%p21_p12) target bundleno = 6 (0x6), region = 110 }
 0x5ab   :  { %1551 = vsyncpa [#allocation6], 1 }
 0x5ac   :  { %1553 = vsyncpa [#allocation6 + $0x1], 1 }
 0x5ad   :  { %1554 = vsyncpa [#allocation8], 1 }

</bundles_post_ra>
